<compile_context>
chip_gen: v7x
topology: tpu7x:2x2x1
jax: 0.10.0
libtpu: 0.0.40
codegen_flags: <defaults>
</compile_context>

<pallas_src>
import functools

import jax
import jax.numpy as jnp
import numpy as np
from jax.experimental import pallas as pl
from jax.experimental.pallas import tpu as pltpu


def _round_up(x, m):
    return ((x + m - 1) // m) * m


# ----------------------------------------------------------------------------
# GRU layer kernel: grid = (T_pad // TS,), TS timesteps per grid iteration.
# Optionally fuses the Linear+Sigmoid head (last layer).
# ----------------------------------------------------------------------------
def _gru_layer_kernel(x_ref, len_ref, w_ih_ref, w_hh_ref, b_ih_ref, b_hh_ref,
                      *rest, ts, hidden_pad, fuse_head):
    if fuse_head:
        lin_w_ref, lin_b_ref, o_ref, h_scratch = rest
    else:
        o_ref, h_scratch = rest

    @pl.when(pl.program_id(0) == 0)
    def _():
        h_scratch[...] = jnp.zeros_like(h_scratch)

    H = hidden_pad
    base_t = pl.program_id(0) * ts

    # Hoisted loads: weights / biases / lengths are grid-invariant.
    lens = len_ref[...]                       # (B_pad, 1) int32
    w_ih = w_ih_ref[...]                      # (IN_pad, 3*H_pad), pre-transposed
    w_hh = w_hh_ref[...]                      # (H_pad, 3*H_pad), pre-transposed
    b_ih = b_ih_ref[...]                      # (1, 3*H_pad)
    b_hh = b_hh_ref[...]                      # (1, 3*H_pad)
    if fuse_head:
        lin_w = lin_w_ref[...]                # (H_pad, OUT_pad), pre-transposed
        lin_b = lin_b_ref[...]                # (1, OUT_pad)

    # Statically unrolled loop over TS timesteps within this block.
    for t_local in range(ts):
        x_t = x_ref[t_local]                  # (B_pad, IN_pad)
        h = h_scratch[...]                    # (B_pad, H_pad)

        # Two fused-gate matmuls (r | z | n packed along the lane axis).
        gi = jnp.dot(x_t, w_ih, preferred_element_type=jnp.float32) + b_ih
        gh = jnp.dot(h, w_hh, preferred_element_type=jnp.float32) + b_hh

        r = jax.nn.sigmoid(gi[:, 0:H] + gh[:, 0:H])
        z = jax.nn.sigmoid(gi[:, H:2 * H] + gh[:, H:2 * H])
        n = jnp.tanh(gi[:, 2 * H:3 * H] + r * gh[:, 2 * H:3 * H])
        h_new = (1.0 - z) * n + z * h

        # Packed-sequence semantics: freeze state and zero output past T[b].
        mask = (base_t + t_local) < lens      # (B_pad, 1) bool
        h_scratch[...] = jnp.where(mask, h_new, h)
        out = jnp.where(mask, h_new, 0.0)

        if fuse_head:
            y = jnp.dot(out, lin_w, preferred_element_type=jnp.float32) + lin_b
            out = jax.nn.sigmoid(y)

        o_ref[t_local] = out.astype(o_ref.dtype)


def gru_layer(x_tm, lengths_col, w_ih_t, w_hh_t, b_ih_row, b_hh_row,
              lin_w_t=None, lin_b_row=None, *, ts, hidden_pad):
    """x_tm: (T_pad, B_pad, IN_pad) time-major. Returns (T_pad, B_pad, OUT_pad)."""
    T_pad, B_pad, IN_pad = x_tm.shape
    fuse_head = lin_w_t is not None
    out_dim = lin_w_t.shape[1] if fuse_head else hidden_pad
    n_steps = T_pad // ts

    kernel = functools.partial(_gru_layer_kernel, ts=ts, hidden_pad=hidden_pad,
                               fuse_head=fuse_head)

    in_specs = [
        pl.BlockSpec((ts, B_pad, IN_pad), lambda s: (s, 0, 0)),          # x block
        pl.BlockSpec((B_pad, 1), lambda s: (0, 0)),                      # lengths
        pl.BlockSpec((IN_pad, 3 * hidden_pad), lambda s: (0, 0)),        # W_ih^T
        pl.BlockSpec((hidden_pad, 3 * hidden_pad), lambda s: (0, 0)),    # W_hh^T
        pl.BlockSpec((1, 3 * hidden_pad), lambda s: (0, 0)),             # b_ih
        pl.BlockSpec((1, 3 * hidden_pad), lambda s: (0, 0)),             # b_hh
    ]
    args = [x_tm, lengths_col, w_ih_t, w_hh_t, b_ih_row, b_hh_row]
    if fuse_head:
        in_specs += [
            pl.BlockSpec((hidden_pad, out_dim), lambda s: (0, 0)),       # lin W^T
            pl.BlockSpec((1, out_dim), lambda s: (0, 0)),                # lin b
        ]
        args += [lin_w_t, lin_b_row]

    # Advisory cost model so XLA schedules the sequential layer calls sensibly.
    flops = 2 * T_pad * B_pad * (IN_pad + hidden_pad) * 3 * hidden_pad
    transcendentals = 3 * T_pad * B_pad * hidden_pad
    if fuse_head:
        flops += 2 * T_pad * B_pad * hidden_pad * out_dim
        transcendentals += T_pad * B_pad * out_dim
    bytes_accessed = 4 * (x_tm.size + T_pad * B_pad * out_dim
                          + w_ih_t.size + w_hh_t.size)

    return pl.pallas_call(
        kernel,
        out_shape=jax.ShapeDtypeStruct((T_pad, B_pad, out_dim), x_tm.dtype),
        grid_spec=pltpu.PrefetchScalarGridSpec(
            num_scalar_prefetch=0,
            grid=(n_steps,),
            in_specs=in_specs,
            out_specs=pl.BlockSpec((ts, B_pad, out_dim), lambda s: (s, 0, 0)),
            scratch_shapes=[pltpu.VMEM((B_pad, hidden_pad), jnp.float32)],
        ),
        compiler_params=pltpu.CompilerParams(
            # MUST be "arbitrary": hidden state carried across grid steps.
            dimension_semantics=("arbitrary",),
            vmem_limit_bytes=48 * 1024 * 1024,
        ),
        cost_estimate=pl.CostEstimate(flops=int(flops),
                                      transcendentals=int(transcendentals),
                                      bytes_accessed=int(bytes_accessed)),
    )(*args)


# ----------------------------------------------------------------------------
# Parameter packing: pre-transpose + pad to lane/sublane-friendly shapes.
# ----------------------------------------------------------------------------
def pack_params(params, z_dim, hidden, lane=128):
    h_pad = _round_up(hidden, lane)

    def pack_w(w, rows_in, rows_pad):
        # w: (3H, rows_in) PyTorch layout -> (rows_pad, 3*h_pad) transposed/padded.
        out = jnp.zeros((rows_pad, 3 * h_pad), jnp.float32)
        for g in range(3):
            blk = jnp.asarray(w[g * hidden:(g + 1) * hidden, :], jnp.float32).T
            out = out.at[:rows_in, g * h_pad:g * h_pad + hidden].set(blk)
        return out

    def pack_b(b):
        b = jnp.asarray(b, jnp.float32).reshape(3, hidden)
        out = jnp.zeros((1, 3 * h_pad), jnp.float32)
        for g in range(3):
            out = out.at[0, g * h_pad:g * h_pad + hidden].set(b[g])
        return out

    layers = []
    for li, layer in enumerate(params["gru"]):
        in_dim = z_dim if li == 0 else hidden
        in_pad = _round_up(in_dim, lane) if li == 0 else h_pad
        layers.append(dict(
            w_ih_t=pack_w(layer["w_ih"], in_dim, in_pad),
            w_hh_t=pack_w(layer["w_hh"], hidden, h_pad),
            b_ih=pack_b(layer["b_ih"]),
            b_hh=pack_b(layer["b_hh"]),
            in_pad=in_pad,
        ))

    lin_w_t = jnp.zeros((h_pad, h_pad), jnp.float32)
    lin_w_t = lin_w_t.at[:hidden, :hidden].set(
        jnp.asarray(params["lin_w"], jnp.float32).T)
    lin_b = jnp.zeros((1, h_pad), jnp.float32)
    lin_b = lin_b.at[0, :hidden].set(
        jnp.asarray(params["lin_b"], jnp.float32).reshape(-1))

    return dict(layers=layers, lin_w_t=lin_w_t, lin_b=lin_b,
                hidden=hidden, h_pad=h_pad, z_dim=z_dim)


# ----------------------------------------------------------------------------
# Generator forward
# ----------------------------------------------------------------------------
def generator_forward(packed, Z, T_lengths, *, ts=8, sublane=8):
    """Z: (B, T, z_dim) float32, T_lengths: (B,) int32. Returns (B, max(T), H)."""
    hidden, h_pad = packed["hidden"], packed["h_pad"]
    lens_np = np.asarray(T_lengths)
    T_max = int(lens_np.max())                     # pad_packed_sequence length
    B = Z.shape[0]

    B_pad = _round_up(max(B, sublane), sublane)
    ts_eff = max(1, min(ts, T_max))
    T_pad = _round_up(T_max, ts_eff)

    # Time-major, zero-padded input for the recurrent kernel.
    in0_pad = packed["layers"][0]["in_pad"]
    x = jnp.zeros((T_pad, B_pad, in0_pad), jnp.float32)
    x = x.at[:T_max, :B, :packed["z_dim"]].set(
        jnp.transpose(Z[:, :T_max, :], (1, 0, 2)).astype(jnp.float32))
    lengths_col = jnp.zeros((B_pad, 1), jnp.int32)
    lengths_col = lengths_col.at[:B, 0].set(jnp.asarray(T_lengths, jnp.int32))

    n_layers = len(packed["layers"])
    for li, layer in enumerate(packed["layers"]):
        is_last = (li == n_layers - 1)
        x = gru_layer(
            x, lengths_col, layer["w_ih_t"], layer["w_hh_t"],
            layer["b_ih"], layer["b_hh"],
            lin_w_t=packed["lin_w_t"] if is_last else None,
            lin_b_row=packed["lin_b"] if is_last else None,
            ts=ts_eff, hidden_pad=h_pad)

    # Back to batch-first, strip padding.
    E = jnp.transpose(x, (1, 0, 2))[:B, :T_max, :hidden]
    return E


# ----------------------------------------------------------------------------
# Deterministic parameter init (PyTorch-style uniform(-1/sqrt(H), 1/sqrt(H)))
# ----------------------------------------------------------------------------
def init_params(key, z_dim, hidden, num_layers):
    k = 1.0 / np.sqrt(hidden)
    params = {"gru": []}
    for layer in range(num_layers):
        in_dim = z_dim if layer == 0 else hidden
        key, k1, k2, k3, k4 = jax.random.split(key, 5)
        params["gru"].append({
            "w_ih": jax.random.uniform(k1, (3 * hidden, in_dim), jnp.float32, -k, k),
            "w_hh": jax.random.uniform(k2, (3 * hidden, hidden), jnp.float32, -k, k),
            "b_ih": jax.random.uniform(k3, (3 * hidden,), jnp.float32, -k, k),
            "b_hh": jax.random.uniform(k4, (3 * hidden,), jnp.float32, -k, k),
        })
    key, k5, k6 = jax.random.split(key, 3)
    params["lin_w"] = jax.random.uniform(k5, (hidden, hidden), jnp.float32, -k, k)
    params["lin_b"] = jax.random.uniform(k6, (hidden,), jnp.float32, -k, k)
    return params


# ----------------------------------------------------------------------------
# Pure-NumPy reference for correctness check
# ----------------------------------------------------------------------------
def reference_forward(params, Z, T_lengths):
    T_max = int(np.max(np.asarray(T_lengths)))
    B, _, _ = Z.shape
    x = np.asarray(Z[:, :T_max, :], np.float32)          # (B, T_max, F)
    for layer in params["gru"]:
        w_ih = np.asarray(layer["w_ih"]); w_hh = np.asarray(layer["w_hh"])
        b_ih = np.asarray(layer["b_ih"]).reshape(-1)
        b_hh = np.asarray(layer["b_hh"]).reshape(-1)
        H = w_hh.shape[1]
        h = np.zeros((B, H), np.float32)
        outs = np.zeros((B, T_max, H), np.float32)
        for t in range(T_max):
            gi = x[:, t, :] @ w_ih.T + b_ih
            gh = h @ w_hh.T + b_hh
            r = 1.0 / (1.0 + np.exp(-(gi[:, :H] + gh[:, :H])))
            z = 1.0 / (1.0 + np.exp(-(gi[:, H:2 * H] + gh[:, H:2 * H])))
            n = np.tanh(gi[:, 2 * H:] + r * gh[:, 2 * H:])
            h_new = (1.0 - z) * n + z * h
            mask = (t < np.asarray(T_lengths)).reshape(B, 1)
            h = np.where(mask, h_new, h)
            outs[:, t, :] = np.where(mask, h_new, 0.0)
        x = outs
    lin = x @ np.asarray(params["lin_w"]).T + np.asarray(params["lin_b"]).reshape(-1)
    return 1.0 / (1.0 + np.exp(-lin))


if __name__ == "__main__":
    B, S, Z_DIM, HIDDEN, NUM_LAYERS = 4, 8, 8, 32, 2

    key = jax.random.PRNGKey(0)
    key, kz = jax.random.split(key)
    Z = jax.random.normal(kz, (B, S, Z_DIM), jnp.float32)
    T_lengths = jnp.array([8, 5, 8, 3], jnp.int32)       # max(T) == S here

    params = init_params(key, Z_DIM, HIDDEN, NUM_LAYERS)
    packed = pack_params(params, Z_DIM, HIDDEN)

    E = generator_forward(packed, Z, T_lengths)
    E = jax.block_until_ready(E)

    E_ref = reference_forward(params, Z, T_lengths)
    np.testing.assert_allclose(np.asarray(E), E_ref, rtol=1e-5, atol=1e-5)

    print("KERNEL_OK")
</pallas_src>

<mosaic_0001>
module attributes {stable_mosaic.version = 11 : i64} {
  func.func @_gru_layer_kernel(%arg0: i32, %arg1: memref<8x8x128xf32, #tpu.memory_space<vmem>>, %arg2: memref<8x1xi32, #tpu.memory_space<vmem>>, %arg3: memref<128x384xf32, #tpu.memory_space<vmem>>, %arg4: memref<128x384xf32, #tpu.memory_space<vmem>>, %arg5: memref<1x384xf32, #tpu.memory_space<vmem>>, %arg6: memref<1x384xf32, #tpu.memory_space<vmem>>, %arg7: memref<8x8x128xf32, #tpu.memory_space<vmem>>, %arg8: memref<8x128xf32, #tpu.memory_space<vmem>>) attributes {dimension_semantics = [#tpu.dimension_semantics<arbitrary>], iteration_bounds = array<i64: 1>, scalar_prefetch = 0 : i64, scratch_operands = 1 : i64, tpu.core_type = #tpu.core_type<tc>, window_params = [{transform_indices = @transform_0, window_bounds = array<i64: 8, 8, 128>}, {pipeline_mode = #tpu.pipeline_mode<synchronous>, transform_indices = @transform_1, window_bounds = array<i64: 8, 1>}, {pipeline_mode = #tpu.pipeline_mode<synchronous>, transform_indices = @transform_2, window_bounds = array<i64: 128, 384>}, {pipeline_mode = #tpu.pipeline_mode<synchronous>, transform_indices = @transform_3, window_bounds = array<i64: 128, 384>}, {pipeline_mode = #tpu.pipeline_mode<synchronous>, transform_indices = @transform_4, window_bounds = array<i64: 1, 384>}, {pipeline_mode = #tpu.pipeline_mode<synchronous>, transform_indices = @transform_5, window_bounds = array<i64: 1, 384>}, {transform_indices = @transform_6, window_bounds = array<i64: 8, 8, 128>}]} {
    %c0_i32 = arith.constant 0 : i32
    %0 = arith.cmpi eq, %arg0, %c0_i32 : i32
    %1 = arith.extui %0 : i1 to i32
    %c0_i32_0 = arith.constant 0 : i32
    %2 = arith.cmpi ne, %1, %c0_i32_0 : i32
    scf.if %2 {
      %cst_131 = arith.constant 0.000000e+00 : f32
      %401 = vector.broadcast %cst_131 : f32 to vector<8x128xf32>
      %c0_132 = arith.constant 0 : index
      %c0_133 = arith.constant 0 : index
      %402 = vector.load %arg8[%c0_132, %c0_133] : memref<8x128xf32, #tpu.memory_space<vmem>>, vector<8x128xf32>
      tpu.vector_store %arg8[%c0_132, %c0_133], %401 {strides = array<i32>} : memref<8x128xf32, #tpu.memory_space<vmem>>, vector<8x128xf32>,
    } else {
    }
    %c8_i32 = arith.constant 8 : i32
    %3 = arith.muli %arg0, %c8_i32 : i32
    %c0 = arith.constant 0 : index
    %c0_1 = arith.constant 0 : index
    %4 = vector.load %arg2[%c0, %c0_1] : memref<8x1xi32, #tpu.memory_space<vmem>>, vector<8x1xi32>
    %c0_2 = arith.constant 0 : index
    %c0_3 = arith.constant 0 : index
    %5 = vector.load %arg3[%c0_2, %c0_3] : memref<128x384xf32, #tpu.memory_space<vmem>>, vector<128x384xf32>
    %c0_4 = arith.constant 0 : index
    %c0_5 = arith.constant 0 : index
    %6 = vector.load %arg4[%c0_4, %c0_5] : memref<128x384xf32, #tpu.memory_space<vmem>>, vector<128x384xf32>
    %c0_6 = arith.constant 0 : index
    %c0_7 = arith.constant 0 : index
    %7 = vector.load %arg5[%c0_6, %c0_7] : memref<1x384xf32, #tpu.memory_space<vmem>>, vector<1x384xf32>
    %c0_8 = arith.constant 0 : index
    %c0_9 = arith.constant 0 : index
    %8 = vector.load %arg6[%c0_8, %c0_9] : memref<1x384xf32, #tpu.memory_space<vmem>>, vector<1x384xf32>
    %c0_10 = arith.constant 0 : index
    %c0_11 = arith.constant 0 : index
    %c0_12 = arith.constant 0 : index
    %9 = vector.load %arg1[%c0_10, %c0_11, %c0_12] : memref<8x8x128xf32, #tpu.memory_space<vmem>>, vector<1x8x128xf32>
    %10 = vector.shape_cast %9 : vector<1x8x128xf32> to vector<8x128xf32>
    %c0_13 = arith.constant 0 : index
    %c0_14 = arith.constant 0 : index
    %11 = vector.load %arg8[%c0_13, %c0_14] : memref<8x128xf32, #tpu.memory_space<vmem>>, vector<8x128xf32>
    %cst = arith.constant dense<0.000000e+00> : vector<8x384xf32>
    %12 = tpu.matmul %10, %5, %cst {dimension_numbers = #tpu.dot_dimension_numbers<[1], [0], [0], [1], [0, 0, 1, 1], [], []>} : vector<8x128xf32>, vector<128x384xf32>, vector<8x384xf32> -> vector<8x384xf32>
    %13 = vector.broadcast %7 : vector<1x384xf32> to vector<8x384xf32>
    %14 = arith.addf %12, %13 : vector<8x384xf32>
    %cst_15 = arith.constant dense<0.000000e+00> : vector<8x384xf32>
    %15 = tpu.matmul %11, %6, %cst_15 {dimension_numbers = #tpu.dot_dimension_numbers<[1], [0], [0], [1], [0, 0, 1, 1], [], []>} : vector<8x128xf32>, vector<128x384xf32>, vector<8x384xf32> -> vector<8x384xf32>
    %16 = vector.broadcast %8 : vector<1x384xf32> to vector<8x384xf32>
    %17 = arith.addf %15, %16 : vector<8x384xf32>
    %18 = vector.extract_strided_slice %14 {offsets = [0, 0], sizes = [8, 128], strides = [1, 1]} : vector<8x384xf32> to vector<8x128xf32>
    %19 = vector.extract_strided_slice %17 {offsets = [0, 0], sizes = [8, 128], strides = [1, 1]} : vector<8x384xf32> to vector<8x128xf32>
    %20 = arith.addf %18, %19 : vector<8x128xf32>
    %21 = arith.negf %20 : vector<8x128xf32>
    %22 = math.exp %21 : vector<8x128xf32>
    %cst_16 = arith.constant 1.000000e+00 : f32
    %23 = vector.broadcast %cst_16 : f32 to vector<8x128xf32>
    %24 = arith.addf %23, %22 : vector<8x128xf32>
    %25 = arith.divf %23, %24 : vector<8x128xf32>
    %26 = vector.extract_strided_slice %14 {offsets = [0, 128], sizes = [8, 128], strides = [1, 1]} : vector<8x384xf32> to vector<8x128xf32>
    %27 = vector.extract_strided_slice %17 {offsets = [0, 128], sizes = [8, 128], strides = [1, 1]} : vector<8x384xf32> to vector<8x128xf32>
    %28 = arith.addf %26, %27 : vector<8x128xf32>
    %29 = arith.negf %28 : vector<8x128xf32>
    %30 = math.exp %29 : vector<8x128xf32>
    %cst_17 = arith.constant 1.000000e+00 : f32
    %31 = vector.broadcast %cst_17 : f32 to vector<8x128xf32>
    %32 = arith.addf %31, %30 : vector<8x128xf32>
    %33 = arith.divf %31, %32 : vector<8x128xf32>
    %34 = vector.extract_strided_slice %14 {offsets = [0, 256], sizes = [8, 128], strides = [1, 1]} : vector<8x384xf32> to vector<8x128xf32>
    %35 = vector.extract_strided_slice %17 {offsets = [0, 256], sizes = [8, 128], strides = [1, 1]} : vector<8x384xf32> to vector<8x128xf32>
    %36 = arith.mulf %25, %35 : vector<8x128xf32>
    %37 = arith.addf %34, %36 : vector<8x128xf32>
    %38 = math.tanh %37 : vector<8x128xf32>
    %cst_18 = arith.constant 1.000000e+00 : f32
    %39 = vector.broadcast %cst_18 : f32 to vector<8x128xf32>
    %40 = arith.subf %39, %33 : vector<8x128xf32>
    %41 = arith.mulf %40, %38 : vector<8x128xf32>
    %42 = arith.mulf %33, %11 : vector<8x128xf32>
    %43 = arith.addf %41, %42 : vector<8x128xf32>
    %c0_i32_19 = arith.constant 0 : i32
    %44 = arith.addi %3, %c0_i32_19 : i32
    %45 = vector.broadcast %44 : i32 to vector<8x1xi32>
    %46 = arith.cmpi slt, %45, %4 : vector<8x1xi32>
    %47 = vector.shape_cast %46 : vector<8x1xi1> to vector<8x1xi1>
    %48 = vector.broadcast %47 : vector<8x1xi1> to vector<8x128xi1>
    %49 = arith.select %48, %43, %11 : vector<8x128xi1>, vector<8x128xf32>
    %c0_20 = arith.constant 0 : index
    %c0_21 = arith.constant 0 : index
    %50 = vector.load %arg8[%c0_20, %c0_21] : memref<8x128xf32, #tpu.memory_space<vmem>>, vector<8x128xf32>
    tpu.vector_store %arg8[%c0_20, %c0_21], %49 {strides = array<i32>} : memref<8x128xf32, #tpu.memory_space<vmem>>, vector<8x128xf32>,
    %cst_22 = arith.constant 0.000000e+00 : f32
    %51 = vector.shape_cast %46 : vector<8x1xi1> to vector<8x1xi1>
    %52 = vector.broadcast %51 : vector<8x1xi1> to vector<8x128xi1>
    %53 = vector.broadcast %cst_22 : f32 to vector<8x128xf32>
    %54 = arith.select %52, %43, %53 : vector<8x128xi1>, vector<8x128xf32>
    %c0_23 = arith.constant 0 : index
    %c0_24 = arith.constant 0 : index
    %c0_25 = arith.constant 0 : index
    %55 = vector.load %arg7[%c0_23, %c0_24, %c0_25] : memref<8x8x128xf32, #tpu.memory_space<vmem>>, vector<1x8x128xf32>
    %56 = vector.shape_cast %55 : vector<1x8x128xf32> to vector<8x128xf32>
    %57 = vector.shape_cast %54 : vector<8x128xf32> to vector<1x8x128xf32>
    tpu.vector_store %arg7[%c0_23, %c0_24, %c0_25], %57 {strides = array<i32>} : memref<8x8x128xf32, #tpu.memory_space<vmem>>, vector<1x8x128xf32>,
    %c1 = arith.constant 1 : index
    %c0_26 = arith.constant 0 : index
    %c0_27 = arith.constant 0 : index
    %58 = vector.load %arg1[%c1, %c0_26, %c0_27] : memref<8x8x128xf32, #tpu.memory_space<vmem>>, vector<1x8x128xf32>
    %59 = vector.shape_cast %58 : vector<1x8x128xf32> to vector<8x128xf32>
    %c0_28 = arith.constant 0 : index
    %c0_29 = arith.constant 0 : index
    %60 = vector.load %arg8[%c0_28, %c0_29] : memref<8x128xf32, #tpu.memory_space<vmem>>, vector<8x128xf32>
    %cst_30 = arith.constant dense<0.000000e+00> : vector<8x384xf32>
    %61 = tpu.matmul %59, %5, %cst_30 {dimension_numbers = #tpu.dot_dimension_numbers<[1], [0], [0], [1], [0, 0, 1, 1], [], []>} : vector<8x128xf32>, vector<128x384xf32>, vector<8x384xf32> -> vector<8x384xf32>
    %62 = vector.broadcast %7 : vector<1x384xf32> to vector<8x384xf32>
    %63 = arith.addf %61, %62 : vector<8x384xf32>
    %cst_31 = arith.constant dense<0.000000e+00> : vector<8x384xf32>
    %64 = tpu.matmul %60, %6, %cst_31 {dimension_numbers = #tpu.dot_dimension_numbers<[1], [0], [0], [1], [0, 0, 1, 1], [], []>} : vector<8x128xf32>, vector<128x384xf32>, vector<8x384xf32> -> vector<8x384xf32>
    %65 = vector.broadcast %8 : vector<1x384xf32> to vector<8x384xf32>
    %66 = arith.addf %64, %65 : vector<8x384xf32>
    %67 = vector.extract_strided_slice %63 {offsets = [0, 0], sizes = [8, 128], strides = [1, 1]} : vector<8x384xf32> to vector<8x128xf32>
    %68 = vector.extract_strided_slice %66 {offsets = [0, 0], sizes = [8, 128], strides = [1, 1]} : vector<8x384xf32> to vector<8x128xf32>
    %69 = arith.addf %67, %68 : vector<8x128xf32>
    %70 = arith.negf %69 : vector<8x128xf32>
    %71 = math.exp %70 : vector<8x128xf32>
    %cst_32 = arith.constant 1.000000e+00 : f32
    %72 = vector.broadcast %cst_32 : f32 to vector<8x128xf32>
    %73 = arith.addf %72, %71 : vector<8x128xf32>
    %74 = arith.divf %72, %73 : vector<8x128xf32>
    %75 = vector.extract_strided_slice %63 {offsets = [0, 128], sizes = [8, 128], strides = [1, 1]} : vector<8x384xf32> to vector<8x128xf32>
    %76 = vector.extract_strided_slice %66 {offsets = [0, 128], sizes = [8, 128], strides = [1, 1]} : vector<8x384xf32> to vector<8x128xf32>
    %77 = arith.addf %75, %76 : vector<8x128xf32>
    %78 = arith.negf %77 : vector<8x128xf32>
    %79 = math.exp %78 : vector<8x128xf32>
    %cst_33 = arith.constant 1.000000e+00 : f32
    %80 = vector.broadcast %cst_33 : f32 to vector<8x128xf32>
    %81 = arith.addf %80, %79 : vector<8x128xf32>
    %82 = arith.divf %80, %81 : vector<8x128xf32>
    %83 = vector.extract_strided_slice %63 {offsets = [0, 256], sizes = [8, 128], strides = [1, 1]} : vector<8x384xf32> to vector<8x128xf32>
    %84 = vector.extract_strided_slice %66 {offsets = [0, 256], sizes = [8, 128], strides = [1, 1]} : vector<8x384xf32> to vector<8x128xf32>
    %85 = arith.mulf %74, %84 : vector<8x128xf32>
    %86 = arith.addf %83, %85 : vector<8x128xf32>
    %87 = math.tanh %86 : vector<8x128xf32>
    %cst_34 = arith.constant 1.000000e+00 : f32
    %88 = vector.broadcast %cst_34 : f32 to vector<8x128xf32>
    %89 = arith.subf %88, %82 : vector<8x128xf32>
    %90 = arith.mulf %89, %87 : vector<8x128xf32>
    %91 = arith.mulf %82, %60 : vector<8x128xf32>
    %92 = arith.addf %90, %91 : vector<8x128xf32>
    %c1_i32 = arith.constant 1 : i32
    %93 = arith.addi %3, %c1_i32 : i32
    %94 = vector.broadcast %93 : i32 to vector<8x1xi32>
    %95 = arith.cmpi slt, %94, %4 : vector<8x1xi32>
    %96 = vector.shape_cast %95 : vector<8x1xi1> to vector<8x1xi1>
    %97 = vector.broadcast %96 : vector<8x1xi1> to vector<8x128xi1>
    %98 = arith.select %97, %92, %60 : vector<8x128xi1>, vector<8x128xf32>
    %c0_35 = arith.constant 0 : index
    %c0_36 = arith.constant 0 : index
    %99 = vector.load %arg8[%c0_35, %c0_36] : memref<8x128xf32, #tpu.memory_space<vmem>>, vector<8x128xf32>
    tpu.vector_store %arg8[%c0_35, %c0_36], %98 {strides = array<i32>} : memref<8x128xf32, #tpu.memory_space<vmem>>, vector<8x128xf32>,
    %cst_37 = arith.constant 0.000000e+00 : f32
    %100 = vector.shape_cast %95 : vector<8x1xi1> to vector<8x1xi1>
    %101 = vector.broadcast %100 : vector<8x1xi1> to vector<8x128xi1>
    %102 = vector.broadcast %cst_37 : f32 to vector<8x128xf32>
    %103 = arith.select %101, %92, %102 : vector<8x128xi1>, vector<8x128xf32>
    %c1_38 = arith.constant 1 : index
    %c0_39 = arith.constant 0 : index
    %c0_40 = arith.constant 0 : index
    %104 = vector.load %arg7[%c1_38, %c0_39, %c0_40] : memref<8x8x128xf32, #tpu.memory_space<vmem>>, vector<1x8x128xf32>
    %105 = vector.shape_cast %104 : vector<1x8x128xf32> to vector<8x128xf32>
    %106 = vector.shape_cast %103 : vector<8x128xf32> to vector<1x8x128xf32>
    tpu.vector_store %arg7[%c1_38, %c0_39, %c0_40], %106 {strides = array<i32>} : memref<8x8x128xf32, #tpu.memory_space<vmem>>, vector<1x8x128xf32>,
    %c2 = arith.constant 2 : index
    %c0_41 = arith.constant 0 : index
    %c0_42 = arith.constant 0 : index
    %107 = vector.load %arg1[%c2, %c0_41, %c0_42] : memref<8x8x128xf32, #tpu.memory_space<vmem>>, vector<1x8x128xf32>
    %108 = vector.shape_cast %107 : vector<1x8x128xf32> to vector<8x128xf32>
    %c0_43 = arith.constant 0 : index
    %c0_44 = arith.constant 0 : index
    %109 = vector.load %arg8[%c0_43, %c0_44] : memref<8x128xf32, #tpu.memory_space<vmem>>, vector<8x128xf32>
    %cst_45 = arith.constant dense<0.000000e+00> : vector<8x384xf32>
    %110 = tpu.matmul %108, %5, %cst_45 {dimension_numbers = #tpu.dot_dimension_numbers<[1], [0], [0], [1], [0, 0, 1, 1], [], []>} : vector<8x128xf32>, vector<128x384xf32>, vector<8x384xf32> -> vector<8x384xf32>
    %111 = vector.broadcast %7 : vector<1x384xf32> to vector<8x384xf32>
    %112 = arith.addf %110, %111 : vector<8x384xf32>
    %cst_46 = arith.constant dense<0.000000e+00> : vector<8x384xf32>
    %113 = tpu.matmul %109, %6, %cst_46 {dimension_numbers = #tpu.dot_dimension_numbers<[1], [0], [0], [1], [0, 0, 1, 1], [], []>} : vector<8x128xf32>, vector<128x384xf32>, vector<8x384xf32> -> vector<8x384xf32>
    %114 = vector.broadcast %8 : vector<1x384xf32> to vector<8x384xf32>
    %115 = arith.addf %113, %114 : vector<8x384xf32>
    %116 = vector.extract_strided_slice %112 {offsets = [0, 0], sizes = [8, 128], strides = [1, 1]} : vector<8x384xf32> to vector<8x128xf32>
    %117 = vector.extract_strided_slice %115 {offsets = [0, 0], sizes = [8, 128], strides = [1, 1]} : vector<8x384xf32> to vector<8x128xf32>
    %118 = arith.addf %116, %117 : vector<8x128xf32>
    %119 = arith.negf %118 : vector<8x128xf32>
    %120 = math.exp %119 : vector<8x128xf32>
    %cst_47 = arith.constant 1.000000e+00 : f32
    %121 = vector.broadcast %cst_47 : f32 to vector<8x128xf32>
    %122 = arith.addf %121, %120 : vector<8x128xf32>
    %123 = arith.divf %121, %122 : vector<8x128xf32>
    %124 = vector.extract_strided_slice %112 {offsets = [0, 128], sizes = [8, 128], strides = [1, 1]} : vector<8x384xf32> to vector<8x128xf32>
    %125 = vector.extract_strided_slice %115 {offsets = [0, 128], sizes = [8, 128], strides = [1, 1]} : vector<8x384xf32> to vector<8x128xf32>
    %126 = arith.addf %124, %125 : vector<8x128xf32>
    %127 = arith.negf %126 : vector<8x128xf32>
    %128 = math.exp %127 : vector<8x128xf32>
    %cst_48 = arith.constant 1.000000e+00 : f32
    %129 = vector.broadcast %cst_48 : f32 to vector<8x128xf32>
    %130 = arith.addf %129, %128 : vector<8x128xf32>
    %131 = arith.divf %129, %130 : vector<8x128xf32>
    %132 = vector.extract_strided_slice %112 {offsets = [0, 256], sizes = [8, 128], strides = [1, 1]} : vector<8x384xf32> to vector<8x128xf32>
    %133 = vector.extract_strided_slice %115 {offsets = [0, 256], sizes = [8, 128], strides = [1, 1]} : vector<8x384xf32> to vector<8x128xf32>
    %134 = arith.mulf %123, %133 : vector<8x128xf32>
    %135 = arith.addf %132, %134 : vector<8x128xf32>
    %136 = math.tanh %135 : vector<8x128xf32>
    %cst_49 = arith.constant 1.000000e+00 : f32
    %137 = vector.broadcast %cst_49 : f32 to vector<8x128xf32>
    %138 = arith.subf %137, %131 : vector<8x128xf32>
    %139 = arith.mulf %138, %136 : vector<8x128xf32>
    %140 = arith.mulf %131, %109 : vector<8x128xf32>
    %141 = arith.addf %139, %140 : vector<8x128xf32>
    %c2_i32 = arith.constant 2 : i32
    %142 = arith.addi %3, %c2_i32 : i32
    %143 = vector.broadcast %142 : i32 to vector<8x1xi32>
    %144 = arith.cmpi slt, %143, %4 : vector<8x1xi32>
    %145 = vector.shape_cast %144 : vector<8x1xi1> to vector<8x1xi1>
    %146 = vector.broadcast %145 : vector<8x1xi1> to vector<8x128xi1>
    %147 = arith.select %146, %141, %109 : vector<8x128xi1>, vector<8x128xf32>
    %c0_50 = arith.constant 0 : index
    %c0_51 = arith.constant 0 : index
    %148 = vector.load %arg8[%c0_50, %c0_51] : memref<8x128xf32, #tpu.memory_space<vmem>>, vector<8x128xf32>
    tpu.vector_store %arg8[%c0_50, %c0_51], %147 {strides = array<i32>} : memref<8x128xf32, #tpu.memory_space<vmem>>, vector<8x128xf32>,
    %cst_52 = arith.constant 0.000000e+00 : f32
    %149 = vector.shape_cast %144 : vector<8x1xi1> to vector<8x1xi1>
    %150 = vector.broadcast %149 : vector<8x1xi1> to vector<8x128xi1>
    %151 = vector.broadcast %cst_52 : f32 to vector<8x128xf32>
    %152 = arith.select %150, %141, %151 : vector<8x128xi1>, vector<8x128xf32>
    %c2_53 = arith.constant 2 : index
    %c0_54 = arith.constant 0 : index
    %c0_55 = arith.constant 0 : index
    %153 = vector.load %arg7[%c2_53, %c0_54, %c0_55] : memref<8x8x128xf32, #tpu.memory_space<vmem>>, vector<1x8x128xf32>
    %154 = vector.shape_cast %153 : vector<1x8x128xf32> to vector<8x128xf32>
    %155 = vector.shape_cast %152 : vector<8x128xf32> to vector<1x8x128xf32>
    tpu.vector_store %arg7[%c2_53, %c0_54, %c0_55], %155 {strides = array<i32>} : memref<8x8x128xf32, #tpu.memory_space<vmem>>, vector<1x8x128xf32>,
    %c3 = arith.constant 3 : index
    %c0_56 = arith.constant 0 : index
    %c0_57 = arith.constant 0 : index
    %156 = vector.load %arg1[%c3, %c0_56, %c0_57] : memref<8x8x128xf32, #tpu.memory_space<vmem>>, vector<1x8x128xf32>
    %157 = vector.shape_cast %156 : vector<1x8x128xf32> to vector<8x128xf32>
    %c0_58 = arith.constant 0 : index
    %c0_59 = arith.constant 0 : index
    %158 = vector.load %arg8[%c0_58, %c0_59] : memref<8x128xf32, #tpu.memory_space<vmem>>, vector<8x128xf32>
    %cst_60 = arith.constant dense<0.000000e+00> : vector<8x384xf32>
    %159 = tpu.matmul %157, %5, %cst_60 {dimension_numbers = #tpu.dot_dimension_numbers<[1], [0], [0], [1], [0, 0, 1, 1], [], []>} : vector<8x128xf32>, vector<128x384xf32>, vector<8x384xf32> -> vector<8x384xf32>
    %160 = vector.broadcast %7 : vector<1x384xf32> to vector<8x384xf32>
    %161 = arith.addf %159, %160 : vector<8x384xf32>
    %cst_61 = arith.constant dense<0.000000e+00> : vector<8x384xf32>
    %162 = tpu.matmul %158, %6, %cst_61 {dimension_numbers = #tpu.dot_dimension_numbers<[1], [0], [0], [1], [0, 0, 1, 1], [], []>} : vector<8x128xf32>, vector<128x384xf32>, vector<8x384xf32> -> vector<8x384xf32>
    %163 = vector.broadcast %8 : vector<1x384xf32> to vector<8x384xf32>
    %164 = arith.addf %162, %163 : vector<8x384xf32>
    %165 = vector.extract_strided_slice %161 {offsets = [0, 0], sizes = [8, 128], strides = [1, 1]} : vector<8x384xf32> to vector<8x128xf32>
    %166 = vector.extract_strided_slice %164 {offsets = [0, 0], sizes = [8, 128], strides = [1, 1]} : vector<8x384xf32> to vector<8x128xf32>
    %167 = arith.addf %165, %166 : vector<8x128xf32>
    %168 = arith.negf %167 : vector<8x128xf32>
    %169 = math.exp %168 : vector<8x128xf32>
    %cst_62 = arith.constant 1.000000e+00 : f32
    %170 = vector.broadcast %cst_62 : f32 to vector<8x128xf32>
    %171 = arith.addf %170, %169 : vector<8x128xf32>
    %172 = arith.divf %170, %171 : vector<8x128xf32>
    %173 = vector.extract_strided_slice %161 {offsets = [0, 128], sizes = [8, 128], strides = [1, 1]} : vector<8x384xf32> to vector<8x128xf32>
    %174 = vector.extract_strided_slice %164 {offsets = [0, 128], sizes = [8, 128], strides = [1, 1]} : vector<8x384xf32> to vector<8x128xf32>
    %175 = arith.addf %173, %174 : vector<8x128xf32>
    %176 = arith.negf %175 : vector<8x128xf32>
    %177 = math.exp %176 : vector<8x128xf32>
    %cst_63 = arith.constant 1.000000e+00 : f32
    %178 = vector.broadcast %cst_63 : f32 to vector<8x128xf32>
    %179 = arith.addf %178, %177 : vector<8x128xf32>
    %180 = arith.divf %178, %179 : vector<8x128xf32>
    %181 = vector.extract_strided_slice %161 {offsets = [0, 256], sizes = [8, 128], strides = [1, 1]} : vector<8x384xf32> to vector<8x128xf32>
    %182 = vector.extract_strided_slice %164 {offsets = [0, 256], sizes = [8, 128], strides = [1, 1]} : vector<8x384xf32> to vector<8x128xf32>
    %183 = arith.mulf %172, %182 : vector<8x128xf32>
    %184 = arith.addf %181, %183 : vector<8x128xf32>
    %185 = math.tanh %184 : vector<8x128xf32>
    %cst_64 = arith.constant 1.000000e+00 : f32
    %186 = vector.broadcast %cst_64 : f32 to vector<8x128xf32>
    %187 = arith.subf %186, %180 : vector<8x128xf32>
    %188 = arith.mulf %187, %185 : vector<8x128xf32>
    %189 = arith.mulf %180, %158 : vector<8x128xf32>
    %190 = arith.addf %188, %189 : vector<8x128xf32>
    %c3_i32 = arith.constant 3 : i32
    %191 = arith.addi %3, %c3_i32 : i32
    %192 = vector.broadcast %191 : i32 to vector<8x1xi32>
    %193 = arith.cmpi slt, %192, %4 : vector<8x1xi32>
    %194 = vector.shape_cast %193 : vector<8x1xi1> to vector<8x1xi1>
    %195 = vector.broadcast %194 : vector<8x1xi1> to vector<8x128xi1>
    %196 = arith.select %195, %190, %158 : vector<8x128xi1>, vector<8x128xf32>
    %c0_65 = arith.constant 0 : index
    %c0_66 = arith.constant 0 : index
    %197 = vector.load %arg8[%c0_65, %c0_66] : memref<8x128xf32, #tpu.memory_space<vmem>>, vector<8x128xf32>
    tpu.vector_store %arg8[%c0_65, %c0_66], %196 {strides = array<i32>} : memref<8x128xf32, #tpu.memory_space<vmem>>, vector<8x128xf32>,
    %cst_67 = arith.constant 0.000000e+00 : f32
    %198 = vector.shape_cast %193 : vector<8x1xi1> to vector<8x1xi1>
    %199 = vector.broadcast %198 : vector<8x1xi1> to vector<8x128xi1>
    %200 = vector.broadcast %cst_67 : f32 to vector<8x128xf32>
    %201 = arith.select %199, %190, %200 : vector<8x128xi1>, vector<8x128xf32>
    %c3_68 = arith.constant 3 : index
    %c0_69 = arith.constant 0 : index
    %c0_70 = arith.constant 0 : index
    %202 = vector.load %arg7[%c3_68, %c0_69, %c0_70] : memref<8x8x128xf32, #tpu.memory_space<vmem>>, vector<1x8x128xf32>
    %203 = vector.shape_cast %202 : vector<1x8x128xf32> to vector<8x128xf32>
    %204 = vector.shape_cast %201 : vector<8x128xf32> to vector<1x8x128xf32>
    tpu.vector_store %arg7[%c3_68, %c0_69, %c0_70], %204 {strides = array<i32>} : memref<8x8x128xf32, #tpu.memory_space<vmem>>, vector<1x8x128xf32>,
    %c4 = arith.constant 4 : index
    %c0_71 = arith.constant 0 : index
    %c0_72 = arith.constant 0 : index
    %205 = vector.load %arg1[%c4, %c0_71, %c0_72] : memref<8x8x128xf32, #tpu.memory_space<vmem>>, vector<1x8x128xf32>
    %206 = vector.shape_cast %205 : vector<1x8x128xf32> to vector<8x128xf32>
    %c0_73 = arith.constant 0 : index
    %c0_74 = arith.constant 0 : index
    %207 = vector.load %arg8[%c0_73, %c0_74] : memref<8x128xf32, #tpu.memory_space<vmem>>, vector<8x128xf32>
    %cst_75 = arith.constant dense<0.000000e+00> : vector<8x384xf32>
    %208 = tpu.matmul %206, %5, %cst_75 {dimension_numbers = #tpu.dot_dimension_numbers<[1], [0], [0], [1], [0, 0, 1, 1], [], []>} : vector<8x128xf32>, vector<128x384xf32>, vector<8x384xf32> -> vector<8x384xf32>
    %209 = vector.broadcast %7 : vector<1x384xf32> to vector<8x384xf32>
    %210 = arith.addf %208, %209 : vector<8x384xf32>
    %cst_76 = arith.constant dense<0.000000e+00> : vector<8x384xf32>
    %211 = tpu.matmul %207, %6, %cst_76 {dimension_numbers = #tpu.dot_dimension_numbers<[1], [0], [0], [1], [0, 0, 1, 1], [], []>} : vector<8x128xf32>, vector<128x384xf32>, vector<8x384xf32> -> vector<8x384xf32>
    %212 = vector.broadcast %8 : vector<1x384xf32> to vector<8x384xf32>
    %213 = arith.addf %211, %212 : vector<8x384xf32>
    %214 = vector.extract_strided_slice %210 {offsets = [0, 0], sizes = [8, 128], strides = [1, 1]} : vector<8x384xf32> to vector<8x128xf32>
    %215 = vector.extract_strided_slice %213 {offsets = [0, 0], sizes = [8, 128], strides = [1, 1]} : vector<8x384xf32> to vector<8x128xf32>
    %216 = arith.addf %214, %215 : vector<8x128xf32>
    %217 = arith.negf %216 : vector<8x128xf32>
    %218 = math.exp %217 : vector<8x128xf32>
    %cst_77 = arith.constant 1.000000e+00 : f32
    %219 = vector.broadcast %cst_77 : f32 to vector<8x128xf32>
    %220 = arith.addf %219, %218 : vector<8x128xf32>
    %221 = arith.divf %219, %220 : vector<8x128xf32>
    %222 = vector.extract_strided_slice %210 {offsets = [0, 128], sizes = [8, 128], strides = [1, 1]} : vector<8x384xf32> to vector<8x128xf32>
    %223 = vector.extract_strided_slice %213 {offsets = [0, 128], sizes = [8, 128], strides = [1, 1]} : vector<8x384xf32> to vector<8x128xf32>
    %224 = arith.addf %222, %223 : vector<8x128xf32>
    %225 = arith.negf %224 : vector<8x128xf32>
    %226 = math.exp %225 : vector<8x128xf32>
    %cst_78 = arith.constant 1.000000e+00 : f32
    %227 = vector.broadcast %cst_78 : f32 to vector<8x128xf32>
    %228 = arith.addf %227, %226 : vector<8x128xf32>
    %229 = arith.divf %227, %228 : vector<8x128xf32>
    %230 = vector.extract_strided_slice %210 {offsets = [0, 256], sizes = [8, 128], strides = [1, 1]} : vector<8x384xf32> to vector<8x128xf32>
    %231 = vector.extract_strided_slice %213 {offsets = [0, 256], sizes = [8, 128], strides = [1, 1]} : vector<8x384xf32> to vector<8x128xf32>
    %232 = arith.mulf %221, %231 : vector<8x128xf32>
    %233 = arith.addf %230, %232 : vector<8x128xf32>
    %234 = math.tanh %233 : vector<8x128xf32>
    %cst_79 = arith.constant 1.000000e+00 : f32
    %235 = vector.broadcast %cst_79 : f32 to vector<8x128xf32>
    %236 = arith.subf %235, %229 : vector<8x128xf32>
    %237 = arith.mulf %236, %234 : vector<8x128xf32>
    %238 = arith.mulf %229, %207 : vector<8x128xf32>
    %239 = arith.addf %237, %238 : vector<8x128xf32>
    %c4_i32 = arith.constant 4 : i32
    %240 = arith.addi %3, %c4_i32 : i32
    %241 = vector.broadcast %240 : i32 to vector<8x1xi32>
    %242 = arith.cmpi slt, %241, %4 : vector<8x1xi32>
    %243 = vector.shape_cast %242 : vector<8x1xi1> to vector<8x1xi1>
    %244 = vector.broadcast %243 : vector<8x1xi1> to vector<8x128xi1>
    %245 = arith.select %244, %239, %207 : vector<8x128xi1>, vector<8x128xf32>
    %c0_80 = arith.constant 0 : index
    %c0_81 = arith.constant 0 : index
    %246 = vector.load %arg8[%c0_80, %c0_81] : memref<8x128xf32, #tpu.memory_space<vmem>>, vector<8x128xf32>
    tpu.vector_store %arg8[%c0_80, %c0_81], %245 {strides = array<i32>} : memref<8x128xf32, #tpu.memory_space<vmem>>, vector<8x128xf32>,
    %cst_82 = arith.constant 0.000000e+00 : f32
    %247 = vector.shape_cast %242 : vector<8x1xi1> to vector<8x1xi1>
    %248 = vector.broadcast %247 : vector<8x1xi1> to vector<8x128xi1>
    %249 = vector.broadcast %cst_82 : f32 to vector<8x128xf32>
    %250 = arith.select %248, %239, %249 : vector<8x128xi1>, vector<8x128xf32>
    %c4_83 = arith.constant 4 : index
    %c0_84 = arith.constant 0 : index
    %c0_85 = arith.constant 0 : index
    %251 = vector.load %arg7[%c4_83, %c0_84, %c0_85] : memref<8x8x128xf32, #tpu.memory_space<vmem>>, vector<1x8x128xf32>
    %252 = vector.shape_cast %251 : vector<1x8x128xf32> to vector<8x128xf32>
    %253 = vector.shape_cast %250 : vector<8x128xf32> to vector<1x8x128xf32>
    tpu.vector_store %arg7[%c4_83, %c0_84, %c0_85], %253 {strides = array<i32>} : memref<8x8x128xf32, #tpu.memory_space<vmem>>, vector<1x8x128xf32>,
    %c5 = arith.constant 5 : index
    %c0_86 = arith.constant 0 : index
    %c0_87 = arith.constant 0 : index
    %254 = vector.load %arg1[%c5, %c0_86, %c0_87] : memref<8x8x128xf32, #tpu.memory_space<vmem>>, vector<1x8x128xf32>
    %255 = vector.shape_cast %254 : vector<1x8x128xf32> to vector<8x128xf32>
    %c0_88 = arith.constant 0 : index
    %c0_89 = arith.constant 0 : index
    %256 = vector.load %arg8[%c0_88, %c0_89] : memref<8x128xf32, #tpu.memory_space<vmem>>, vector<8x128xf32>
    %cst_90 = arith.constant dense<0.000000e+00> : vector<8x384xf32>
    %257 = tpu.matmul %255, %5, %cst_90 {dimension_numbers = #tpu.dot_dimension_numbers<[1], [0], [0], [1], [0, 0, 1, 1], [], []>} : vector<8x128xf32>, vector<128x384xf32>, vector<8x384xf32> -> vector<8x384xf32>
    %258 = vector.broadcast %7 : vector<1x384xf32> to vector<8x384xf32>
    %259 = arith.addf %257, %258 : vector<8x384xf32>
    %cst_91 = arith.constant dense<0.000000e+00> : vector<8x384xf32>
    %260 = tpu.matmul %256, %6, %cst_91 {dimension_numbers = #tpu.dot_dimension_numbers<[1], [0], [0], [1], [0, 0, 1, 1], [], []>} : vector<8x128xf32>, vector<128x384xf32>, vector<8x384xf32> -> vector<8x384xf32>
    %261 = vector.broadcast %8 : vector<1x384xf32> to vector<8x384xf32>
    %262 = arith.addf %260, %261 : vector<8x384xf32>
    %263 = vector.extract_strided_slice %259 {offsets = [0, 0], sizes = [8, 128], strides = [1, 1]} : vector<8x384xf32> to vector<8x128xf32>
    %264 = vector.extract_strided_slice %262 {offsets = [0, 0], sizes = [8, 128], strides = [1, 1]} : vector<8x384xf32> to vector<8x128xf32>
    %265 = arith.addf %263, %264 : vector<8x128xf32>
    %266 = arith.negf %265 : vector<8x128xf32>
    %267 = math.exp %266 : vector<8x128xf32>
    %cst_92 = arith.constant 1.000000e+00 : f32
    %268 = vector.broadcast %cst_92 : f32 to vector<8x128xf32>
    %269 = arith.addf %268, %267 : vector<8x128xf32>
    %270 = arith.divf %268, %269 : vector<8x128xf32>
    %271 = vector.extract_strided_slice %259 {offsets = [0, 128], sizes = [8, 128], strides = [1, 1]} : vector<8x384xf32> to vector<8x128xf32>
    %272 = vector.extract_strided_slice %262 {offsets = [0, 128], sizes = [8, 128], strides = [1, 1]} : vector<8x384xf32> to vector<8x128xf32>
    %273 = arith.addf %271, %272 : vector<8x128xf32>
    %274 = arith.negf %273 : vector<8x128xf32>
    %275 = math.exp %274 : vector<8x128xf32>
    %cst_93 = arith.constant 1.000000e+00 : f32
    %276 = vector.broadcast %cst_93 : f32 to vector<8x128xf32>
    %277 = arith.addf %276, %275 : vector<8x128xf32>
    %278 = arith.divf %276, %277 : vector<8x128xf32>
    %279 = vector.extract_strided_slice %259 {offsets = [0, 256], sizes = [8, 128], strides = [1, 1]} : vector<8x384xf32> to vector<8x128xf32>
    %280 = vector.extract_strided_slice %262 {offsets = [0, 256], sizes = [8, 128], strides = [1, 1]} : vector<8x384xf32> to vector<8x128xf32>
    %281 = arith.mulf %270, %280 : vector<8x128xf32>
    %282 = arith.addf %279, %281 : vector<8x128xf32>
    %283 = math.tanh %282 : vector<8x128xf32>
    %cst_94 = arith.constant 1.000000e+00 : f32
    %284 = vector.broadcast %cst_94 : f32 to vector<8x128xf32>
    %285 = arith.subf %284, %278 : vector<8x128xf32>
    %286 = arith.mulf %285, %283 : vector<8x128xf32>
    %287 = arith.mulf %278, %256 : vector<8x128xf32>
    %288 = arith.addf %286, %287 : vector<8x128xf32>
    %c5_i32 = arith.constant 5 : i32
    %289 = arith.addi %3, %c5_i32 : i32
    %290 = vector.broadcast %289 : i32 to vector<8x1xi32>
    %291 = arith.cmpi slt, %290, %4 : vector<8x1xi32>
    %292 = vector.shape_cast %291 : vector<8x1xi1> to vector<8x1xi1>
    %293 = vector.broadcast %292 : vector<8x1xi1> to vector<8x128xi1>
    %294 = arith.select %293, %288, %256 : vector<8x128xi1>, vector<8x128xf32>
    %c0_95 = arith.constant 0 : index
    %c0_96 = arith.constant 0 : index
    %295 = vector.load %arg8[%c0_95, %c0_96] : memref<8x128xf32, #tpu.memory_space<vmem>>, vector<8x128xf32>
    tpu.vector_store %arg8[%c0_95, %c0_96], %294 {strides = array<i32>} : memref<8x128xf32, #tpu.memory_space<vmem>>, vector<8x128xf32>,
    %cst_97 = arith.constant 0.000000e+00 : f32
    %296 = vector.shape_cast %291 : vector<8x1xi1> to vector<8x1xi1>
    %297 = vector.broadcast %296 : vector<8x1xi1> to vector<8x128xi1>
    %298 = vector.broadcast %cst_97 : f32 to vector<8x128xf32>
    %299 = arith.select %297, %288, %298 : vector<8x128xi1>, vector<8x128xf32>
    %c5_98 = arith.constant 5 : index
    %c0_99 = arith.constant 0 : index
    %c0_100 = arith.constant 0 : index
    %300 = vector.load %arg7[%c5_98, %c0_99, %c0_100] : memref<8x8x128xf32, #tpu.memory_space<vmem>>, vector<1x8x128xf32>
    %301 = vector.shape_cast %300 : vector<1x8x128xf32> to vector<8x128xf32>
    %302 = vector.shape_cast %299 : vector<8x128xf32> to vector<1x8x128xf32>
    tpu.vector_store %arg7[%c5_98, %c0_99, %c0_100], %302 {strides = array<i32>} : memref<8x8x128xf32, #tpu.memory_space<vmem>>, vector<1x8x128xf32>,
    %c6 = arith.constant 6 : index
    %c0_101 = arith.constant 0 : index
    %c0_102 = arith.constant 0 : index
    %303 = vector.load %arg1[%c6, %c0_101, %c0_102] : memref<8x8x128xf32, #tpu.memory_space<vmem>>, vector<1x8x128xf32>
    %304 = vector.shape_cast %303 : vector<1x8x128xf32> to vector<8x128xf32>
    %c0_103 = arith.constant 0 : index
    %c0_104 = arith.constant 0 : index
    %305 = vector.load %arg8[%c0_103, %c0_104] : memref<8x128xf32, #tpu.memory_space<vmem>>, vector<8x128xf32>
    %cst_105 = arith.constant dense<0.000000e+00> : vector<8x384xf32>
    %306 = tpu.matmul %304, %5, %cst_105 {dimension_numbers = #tpu.dot_dimension_numbers<[1], [0], [0], [1], [0, 0, 1, 1], [], []>} : vector<8x128xf32>, vector<128x384xf32>, vector<8x384xf32> -> vector<8x384xf32>
    %307 = vector.broadcast %7 : vector<1x384xf32> to vector<8x384xf32>
    %308 = arith.addf %306, %307 : vector<8x384xf32>
    %cst_106 = arith.constant dense<0.000000e+00> : vector<8x384xf32>
    %309 = tpu.matmul %305, %6, %cst_106 {dimension_numbers = #tpu.dot_dimension_numbers<[1], [0], [0], [1], [0, 0, 1, 1], [], []>} : vector<8x128xf32>, vector<128x384xf32>, vector<8x384xf32> -> vector<8x384xf32>
    %310 = vector.broadcast %8 : vector<1x384xf32> to vector<8x384xf32>
    %311 = arith.addf %309, %310 : vector<8x384xf32>
    %312 = vector.extract_strided_slice %308 {offsets = [0, 0], sizes = [8, 128], strides = [1, 1]} : vector<8x384xf32> to vector<8x128xf32>
    %313 = vector.extract_strided_slice %311 {offsets = [0, 0], sizes = [8, 128], strides = [1, 1]} : vector<8x384xf32> to vector<8x128xf32>
    %314 = arith.addf %312, %313 : vector<8x128xf32>
    %315 = arith.negf %314 : vector<8x128xf32>
    %316 = math.exp %315 : vector<8x128xf32>
    %cst_107 = arith.constant 1.000000e+00 : f32
    %317 = vector.broadcast %cst_107 : f32 to vector<8x128xf32>
    %318 = arith.addf %317, %316 : vector<8x128xf32>
    %319 = arith.divf %317, %318 : vector<8x128xf32>
    %320 = vector.extract_strided_slice %308 {offsets = [0, 128], sizes = [8, 128], strides = [1, 1]} : vector<8x384xf32> to vector<8x128xf32>
    %321 = vector.extract_strided_slice %311 {offsets = [0, 128], sizes = [8, 128], strides = [1, 1]} : vector<8x384xf32> to vector<8x128xf32>
    %322 = arith.addf %320, %321 : vector<8x128xf32>
    %323 = arith.negf %322 : vector<8x128xf32>
    %324 = math.exp %323 : vector<8x128xf32>
    %cst_108 = arith.constant 1.000000e+00 : f32
    %325 = vector.broadcast %cst_108 : f32 to vector<8x128xf32>
    %326 = arith.addf %325, %324 : vector<8x128xf32>
    %327 = arith.divf %325, %326 : vector<8x128xf32>
    %328 = vector.extract_strided_slice %308 {offsets = [0, 256], sizes = [8, 128], strides = [1, 1]} : vector<8x384xf32> to vector<8x128xf32>
    %329 = vector.extract_strided_slice %311 {offsets = [0, 256], sizes = [8, 128], strides = [1, 1]} : vector<8x384xf32> to vector<8x128xf32>
    %330 = arith.mulf %319, %329 : vector<8x128xf32>
    %331 = arith.addf %328, %330 : vector<8x128xf32>
    %332 = math.tanh %331 : vector<8x128xf32>
    %cst_109 = arith.constant 1.000000e+00 : f32
    %333 = vector.broadcast %cst_109 : f32 to vector<8x128xf32>
    %334 = arith.subf %333, %327 : vector<8x128xf32>
    %335 = arith.mulf %334, %332 : vector<8x128xf32>
    %336 = arith.mulf %327, %305 : vector<8x128xf32>
    %337 = arith.addf %335, %336 : vector<8x128xf32>
    %c6_i32 = arith.constant 6 : i32
    %338 = arith.addi %3, %c6_i32 : i32
    %339 = vector.broadcast %338 : i32 to vector<8x1xi32>
    %340 = arith.cmpi slt, %339, %4 : vector<8x1xi32>
    %341 = vector.shape_cast %340 : vector<8x1xi1> to vector<8x1xi1>
    %342 = vector.broadcast %341 : vector<8x1xi1> to vector<8x128xi1>
    %343 = arith.select %342, %337, %305 : vector<8x128xi1>, vector<8x128xf32>
    %c0_110 = arith.constant 0 : index
    %c0_111 = arith.constant 0 : index
    %344 = vector.load %arg8[%c0_110, %c0_111] : memref<8x128xf32, #tpu.memory_space<vmem>>, vector<8x128xf32>
    tpu.vector_store %arg8[%c0_110, %c0_111], %343 {strides = array<i32>} : memref<8x128xf32, #tpu.memory_space<vmem>>, vector<8x128xf32>,
    %cst_112 = arith.constant 0.000000e+00 : f32
    %345 = vector.shape_cast %340 : vector<8x1xi1> to vector<8x1xi1>
    %346 = vector.broadcast %345 : vector<8x1xi1> to vector<8x128xi1>
    %347 = vector.broadcast %cst_112 : f32 to vector<8x128xf32>
    %348 = arith.select %346, %337, %347 : vector<8x128xi1>, vector<8x128xf32>
    %c6_113 = arith.constant 6 : index
    %c0_114 = arith.constant 0 : index
    %c0_115 = arith.constant 0 : index
    %349 = vector.load %arg7[%c6_113, %c0_114, %c0_115] : memref<8x8x128xf32, #tpu.memory_space<vmem>>, vector<1x8x128xf32>
    %350 = vector.shape_cast %349 : vector<1x8x128xf32> to vector<8x128xf32>
    %351 = vector.shape_cast %348 : vector<8x128xf32> to vector<1x8x128xf32>
    tpu.vector_store %arg7[%c6_113, %c0_114, %c0_115], %351 {strides = array<i32>} : memref<8x8x128xf32, #tpu.memory_space<vmem>>, vector<1x8x128xf32>,
    %c7 = arith.constant 7 : index
    %c0_116 = arith.constant 0 : index
    %c0_117 = arith.constant 0 : index
    %352 = vector.load %arg1[%c7, %c0_116, %c0_117] : memref<8x8x128xf32, #tpu.memory_space<vmem>>, vector<1x8x128xf32>
    %353 = vector.shape_cast %352 : vector<1x8x128xf32> to vector<8x128xf32>
    %c0_118 = arith.constant 0 : index
    %c0_119 = arith.constant 0 : index
    %354 = vector.load %arg8[%c0_118, %c0_119] : memref<8x128xf32, #tpu.memory_space<vmem>>, vector<8x128xf32>
    %cst_120 = arith.constant dense<0.000000e+00> : vector<8x384xf32>
    %355 = tpu.matmul %353, %5, %cst_120 {dimension_numbers = #tpu.dot_dimension_numbers<[1], [0], [0], [1], [0, 0, 1, 1], [], []>} : vector<8x128xf32>, vector<128x384xf32>, vector<8x384xf32> -> vector<8x384xf32>
    %356 = vector.broadcast %7 : vector<1x384xf32> to vector<8x384xf32>
    %357 = arith.addf %355, %356 : vector<8x384xf32>
    %cst_121 = arith.constant dense<0.000000e+00> : vector<8x384xf32>
    %358 = tpu.matmul %354, %6, %cst_121 {dimension_numbers = #tpu.dot_dimension_numbers<[1], [0], [0], [1], [0, 0, 1, 1], [], []>} : vector<8x128xf32>, vector<128x384xf32>, vector<8x384xf32> -> vector<8x384xf32>
    %359 = vector.broadcast %8 : vector<1x384xf32> to vector<8x384xf32>
    %360 = arith.addf %358, %359 : vector<8x384xf32>
    %361 = vector.extract_strided_slice %357 {offsets = [0, 0], sizes = [8, 128], strides = [1, 1]} : vector<8x384xf32> to vector<8x128xf32>
    %362 = vector.extract_strided_slice %360 {offsets = [0, 0], sizes = [8, 128], strides = [1, 1]} : vector<8x384xf32> to vector<8x128xf32>
    %363 = arith.addf %361, %362 : vector<8x128xf32>
    %364 = arith.negf %363 : vector<8x128xf32>
    %365 = math.exp %364 : vector<8x128xf32>
    %cst_122 = arith.constant 1.000000e+00 : f32
    %366 = vector.broadcast %cst_122 : f32 to vector<8x128xf32>
    %367 = arith.addf %366, %365 : vector<8x128xf32>
    %368 = arith.divf %366, %367 : vector<8x128xf32>
    %369 = vector.extract_strided_slice %357 {offsets = [0, 128], sizes = [8, 128], strides = [1, 1]} : vector<8x384xf32> to vector<8x128xf32>
    %370 = vector.extract_strided_slice %360 {offsets = [0, 128], sizes = [8, 128], strides = [1, 1]} : vector<8x384xf32> to vector<8x128xf32>
    %371 = arith.addf %369, %370 : vector<8x128xf32>
    %372 = arith.negf %371 : vector<8x128xf32>
    %373 = math.exp %372 : vector<8x128xf32>
    %cst_123 = arith.constant 1.000000e+00 : f32
    %374 = vector.broadcast %cst_123 : f32 to vector<8x128xf32>
    %375 = arith.addf %374, %373 : vector<8x128xf32>
    %376 = arith.divf %374, %375 : vector<8x128xf32>
    %377 = vector.extract_strided_slice %357 {offsets = [0, 256], sizes = [8, 128], strides = [1, 1]} : vector<8x384xf32> to vector<8x128xf32>
    %378 = vector.extract_strided_slice %360 {offsets = [0, 256], sizes = [8, 128], strides = [1, 1]} : vector<8x384xf32> to vector<8x128xf32>
    %379 = arith.mulf %368, %378 : vector<8x128xf32>
    %380 = arith.addf %377, %379 : vector<8x128xf32>
    %381 = math.tanh %380 : vector<8x128xf32>
    %cst_124 = arith.constant 1.000000e+00 : f32
    %382 = vector.broadcast %cst_124 : f32 to vector<8x128xf32>
    %383 = arith.subf %382, %376 : vector<8x128xf32>
    %384 = arith.mulf %383, %381 : vector<8x128xf32>
    %385 = arith.mulf %376, %354 : vector<8x128xf32>
    %386 = arith.addf %384, %385 : vector<8x128xf32>
    %c7_i32 = arith.constant 7 : i32
    %387 = arith.addi %3, %c7_i32 : i32
    %388 = vector.broadcast %387 : i32 to vector<8x1xi32>
    %389 = arith.cmpi slt, %388, %4 : vector<8x1xi32>
    %390 = vector.shape_cast %389 : vector<8x1xi1> to vector<8x1xi1>
    %391 = vector.broadcast %390 : vector<8x1xi1> to vector<8x128xi1>
    %392 = arith.select %391, %386, %354 : vector<8x128xi1>, vector<8x128xf32>
    %c0_125 = arith.constant 0 : index
    %c0_126 = arith.constant 0 : index
    %393 = vector.load %arg8[%c0_125, %c0_126] : memref<8x128xf32, #tpu.memory_space<vmem>>, vector<8x128xf32>
    tpu.vector_store %arg8[%c0_125, %c0_126], %392 {strides = array<i32>} : memref<8x128xf32, #tpu.memory_space<vmem>>, vector<8x128xf32>,
    %cst_127 = arith.constant 0.000000e+00 : f32
    %394 = vector.shape_cast %389 : vector<8x1xi1> to vector<8x1xi1>
    %395 = vector.broadcast %394 : vector<8x1xi1> to vector<8x128xi1>
    %396 = vector.broadcast %cst_127 : f32 to vector<8x128xf32>
    %397 = arith.select %395, %386, %396 : vector<8x128xi1>, vector<8x128xf32>
    %c7_128 = arith.constant 7 : index
    %c0_129 = arith.constant 0 : index
    %c0_130 = arith.constant 0 : index
    %398 = vector.load %arg7[%c7_128, %c0_129, %c0_130] : memref<8x8x128xf32, #tpu.memory_space<vmem>>, vector<1x8x128xf32>
    %399 = vector.shape_cast %398 : vector<1x8x128xf32> to vector<8x128xf32>
    %400 = vector.shape_cast %397 : vector<8x128xf32> to vector<1x8x128xf32>
    tpu.vector_store %arg7[%c7_128, %c0_129, %c0_130], %400 {strides = array<i32>} : memref<8x8x128xf32, #tpu.memory_space<vmem>>, vector<1x8x128xf32>,
    return
  }
  func.func @transform_0(%arg0: i32) -> (i32, i32, i32) {
    %c0_i32 = arith.constant 0 : i32
    %c0_i32_0 = arith.constant 0 : i32
    %c0_i32_1 = arith.constant 0 : i32
    return %arg0, %c0_i32, %c0_i32_0 : i32, i32, i32
  }
  func.func @transform_1(%arg0: i32) -> (i32, i32) {
    %c0_i32 = arith.constant 0 : i32
    %c0_i32_0 = arith.constant 0 : i32
    %c0_i32_1 = arith.constant 0 : i32
    return %c0_i32, %c0_i32_0 : i32, i32
  }
  func.func @transform_2(%arg0: i32) -> (i32, i32) {
    %c0_i32 = arith.constant 0 : i32
    %c0_i32_0 = arith.constant 0 : i32
    %c0_i32_1 = arith.constant 0 : i32
    return %c0_i32, %c0_i32_0 : i32, i32
  }
  func.func @transform_3(%arg0: i32) -> (i32, i32) {
    %c0_i32 = arith.constant 0 : i32
    %c0_i32_0 = arith.constant 0 : i32
    %c0_i32_1 = arith.constant 0 : i32
    return %c0_i32, %c0_i32_0 : i32, i32
  }
  func.func @transform_4(%arg0: i32) -> (i32, i32) {
    %c0_i32 = arith.constant 0 : i32
    %c0_i32_0 = arith.constant 0 : i32
    %c0_i32_1 = arith.constant 0 : i32
    return %c0_i32, %c0_i32_0 : i32, i32
  }
  func.func @transform_5(%arg0: i32) -> (i32, i32) {
    %c0_i32 = arith.constant 0 : i32
    %c0_i32_0 = arith.constant 0 : i32
    %c0_i32_1 = arith.constant 0 : i32
    return %c0_i32, %c0_i32_0 : i32, i32
  }
  func.func @transform_6(%arg0: i32) -> (i32, i32, i32) {
    %c0_i32 = arith.constant 0 : i32
    %c0_i32_0 = arith.constant 0 : i32
    %c0_i32_1 = arith.constant 0 : i32
    return %arg0, %c0_i32, %c0_i32_0 : i32, i32, i32
  }
}

</mosaic_0001>

<bundles_post_ra>
// kernel: tpu_custom_call.1
= control target key start
LH: loop header
LB: loop body
LE: loop exit
PB: predicated region body
PF: predicated region fallthrough
CT: control target
= control target key end

     0   :  { %11 = vsyncpa [#allocation4], 0  ;;  %s5631_s0 = inlined_call_operand.hbm [shape: f32[8,8,128], index: 0, kind: input, shape index: {}]   ;;  %s5632_s1 = inlined_call_operand.vmem [shape: s32[8,1], index: 1, kind: input, shape index: {}]   ;;  %s5633_s2 = inlined_call_operand.hbm [shape: f32[128,384], index: 2, kind: input, shape index: {}]   ;;  %s5634_s3 = inlined_call_operand.hbm [shape: f32[128,384], index: 3, kind: input, shape index: {}]   ;;  %s5635_s4 = inlined_call_operand.vmem [shape: f32[1,384], index: 4, kind: input, shape index: {}]   ;;  %s5636_s5 = inlined_call_operand.vmem [shape: f32[1,384], index: 5, kind: input, shape index: {}]   ;;  %s5637_s6 = inlined_call_operand.hbm [shape: f32[8,8,128], index: 6, kind: output, shape index: {}]  }
   0x1   :  { %12 = vsyncpa [#allocation7], 0 }
   0x2   :  { %13 = vsyncpa [#allocation5], 0  ;;  %s4759_s21 = smov [#allocation6]   ;;  %s4665_s25 = scalar_lea.hbm %s5633_s2, 6144 }
   0x3   :  { %s33_s22 = sshll.u32 %s4759_s21, 4  ;;  %p4666_p0 = scmp.ne.s32.totalorder %s5633_s2, %s4665_s25  ;;  %s34_s22 = int_to_ptr.vmem [resolvable:$true] %s33_s22 }
   0x4   :  { %p4669_p1 = scmp.lt.u32.totalorder %s4665_s25, %s5633_s2 }
   0x6   :  { %p4671_p2 = pnand %p4669_p1, %p4666_p0 }
   0x8   :  { %4674 = shalt.err (!%p4671_p2)
}
   0x9   :  { %s4675_s30 = scalar_lea.vmem %s34_s22, 6144  ;;  %p4680_p4 = scmp.lt.s32.totalorder %s34_s22, %s34_s22 }
   0xa   :  { %p4676_p3 = scmp.ne.s32.totalorder %s34_s22, %s4675_s30  ;;  %p4681_p5 = scmp.lt.s32.totalorder %s4675_s30, %s4675_s30 }
   0xc   :  { %p4682_p6 = por %p4681_p5, %p4680_p4 }
   0xe   :  { %p4683_p7 = pnand %p4682_p6, %p4676_p3 }
  0x10   :  { %4686 = shalt.err (!%p4683_p7)
}
  0x11   :  { %s4760_s7 = smov 384   ;;  %s4761_s8 = smov 24  }
  0x12   :  { %39 = dma.hbm_to_vmem [thread:$0]  %s5633_s2, 6144, %s34_s22, [#allocation7], %s4760_s7, %s4760_s7, %s4761_s8  }
  0x13   :  { %s4762_s11 = smov [#allocation3]   ;;  %s4687_s15 = scalar_lea.hbm %s5631_s0, 1024 }
  0x14   :  { %s19_s12 = sshll.u32 %s4762_s11, 4  ;;  %p4688_p8 = scmp.ne.s32.totalorder %s5631_s0, %s4687_s15  ;;  %s20_s12 = int_to_ptr.vmem [resolvable:$true] %s19_s12 }
  0x15   :  { %p4691_p9 = scmp.lt.u32.totalorder %s4687_s15, %s5631_s0 }
  0x17   :  { %p4693_p10 = pnand %p4691_p9, %p4688_p8 }
  0x19   :  { %4696 = shalt.err (!%p4693_p10)
}
  0x1a   :  { %s4697_s20 = scalar_lea.vmem %s20_s12, 1024  ;;  %p4702_p12 = scmp.lt.s32.totalorder %s20_s12, %s20_s12 }
  0x1b   :  { %p4698_p11 = scmp.ne.s32.totalorder %s20_s12, %s4697_s20  ;;  %p4703_p13 = scmp.lt.s32.totalorder %s4697_s20, %s4697_s20 }
  0x1d   :  { %p4704_p0 = por %p4703_p13, %p4702_p12 }
  0x1f   :  { %p4705_p1 = pnand %p4704_p0, %p4698_p11 }
  0x21   :  { %4708 = shalt.err (!%p4705_p1)
}
  0x22   :  { %s4763_s2 = smov 128   ;;  %s4764_s21 = smov 8  }
  0x23   :  { %25 = dma.hbm_to_vmem [thread:$0]  %s5631_s0, 1024, %s20_s12, [#allocation4], %s4763_s2, %s4763_s2, %s4764_s21  }
  0x24   :  { %s4765_s24 = smov [#allocation8]   ;;  %s4709_s28 = scalar_lea.hbm %s5634_s3, 6144 }
  0x25   :  { %s45_s25 = sshll.u32 %s4765_s24, 4  ;;  %p4710_p2 = scmp.ne.s32.totalorder %s5634_s3, %s4709_s28  ;;  %s46_s25 = int_to_ptr.vmem [resolvable:$true] %s45_s25 }
  0x26   :  { %p4713_p3 = scmp.lt.u32.totalorder %s4709_s28, %s5634_s3 }
  0x28   :  { %p4715_p4 = pnand %p4713_p3, %p4710_p2 }
  0x2a   :  { %4718 = shalt.err (!%p4715_p4)
}
  0x2b   :  { %s4719_s11 = scalar_lea.vmem %s46_s25, 6144  ;;  %p4724_p6 = scmp.lt.s32.totalorder %s46_s25, %s46_s25 }
  0x2c   :  { %p4720_p5 = scmp.ne.s32.totalorder %s46_s25, %s4719_s11  ;;  %p4725_p7 = scmp.lt.s32.totalorder %s4719_s11, %s4719_s11 }
  0x2e   :  { %p4726_p8 = por %p4725_p7, %p4724_p6 }
  0x30   :  { %p4727_p9 = pnand %p4726_p8, %p4720_p5 }
  0x32   :  { %4730 = shalt.err (!%p4727_p9)
}
  0x33   :  { %51 = dma.hbm_to_vmem [thread:$0]  %s5634_s3, 6144, %s46_s25, [#allocation7], %s4760_s7, %s4760_s7, %s4761_s8  }
  0x34   :  { %4753 = dma.done.wait [#allocation4], 1024  }
  0x35   :  { %4754 = vsyncadd [#allocation4], 4294966272 }
  0x36   :  { %4755 = dma.done.wait [#allocation7], 12288  }
  0x37   :  { %4756 = vsyncadd [#allocation7], 4294955008  ;;  %v5642_v0 = vmov 0.0|0.0   ;;  %v5640_v1 = vmov 0.0   ;;  %vm4768_vm0 = vmmov 0   ;;  %v5638_v2 = vmov 0  }
  0x38   :  { %3659 = vmatprep.subr.bf16.mxu1 %v5642_v0  ;;  %252 = vmatprep.mubr.f32.mxu0 %v5640_v1  ;;  %v73_v3 = vld [vmem:[#allocation6 + $0x8] sm:$0xff]  ;;  %v76_v4 = vld [vmem:[#allocation6 + $0x20] sm:$0xff]  ;;  %v75_v7 = vld [vmem:[#allocation6 + $0x18] sm:$0xff] }
  0x39   :  { %3099 = vmatprep.mubr.msk.f32.mxu1 %vm4768_vm0, %v5640_v1  ;;  %4583 = vset.pattern.permute.xlu0 %v5638_v2  ;;  %v72_v5 = vld [vmem:[#allocation6] sm:$0xff]  ;;  %v4857_v6 = vpack.c.bf16 %v76_v4, %v73_v3  ;;  %v79_v8 = vld [vmem:[#allocation6 + $0x38] sm:$0xff]  ;;  %v82_v9 = vld [vmem:[#allocation6 + $0x50] sm:$0xff] }
  0x3a   :  { %4584 = vset.pattern.permute.xlu1 %v5638_v2  ;;  %v4859_v10 = vpack.c.bf16 %v75_v7, %v72_v5  ;;  %v4861_v11 = vpack.c.bf16 %v82_v9, %v79_v8  ;;  %v78_v12 = vld [vmem:[#allocation6 + $0x30] sm:$0xff]  ;;  %v81_v13 = vld [vmem:[#allocation6 + $0x48] sm:$0xff]  ;;  %v88_v15 = vld [vmem:[#allocation6 + $0x80] sm:$0xff] }
  0x3b   :  { %5664 = vst [vmem:[#allocation13_spill] sm:$0xff] %v4857_v6  ;;  %v85_v14 = vld [vmem:[#allocation6 + $0x68] sm:$0xff]  ;;  %3628 = vmatprep.subr.bf16.mxu0 %v4857_v6  ;;  %v4865_v16 = vpack.c.bf16 %v81_v13, %v78_v12  ;;  %v84_v18 = vld [vmem:[#allocation6 + $0x60] sm:$0xff]  ;;  %v87_v19 = vld [vmem:[#allocation6 + $0x78] sm:$0xff] }
  0x3c   :  { %3630 = vmatpush1.bf16.msra.mxu0 %v4859_v10  ;;  %v4868_v17 = vpack.c.bf16 %v88_v15, %v85_v14  ;;  %v91_v20 = vld [vmem:[#allocation6 + $0x98] sm:$0xff]  ;;  %v94_v21 = vld [vmem:[#allocation6 + $0xb0] sm:$0xff]  ;;  %v4871_v22 = vpack.c.bf16 %v87_v19, %v84_v18  ;;  %v93_v25 = vld [vmem:[#allocation6 + $0xa8] sm:$0xff] }
  0x3d   :  { %3632 = vmatprep.subr.bf16.mxu0 %v4861_v11  ;;  %v90_v23 = vld [vmem:[#allocation6 + $0x90] sm:$0xff]  ;;  %v4874_v24 = vpack.c.bf16 %v94_v21, %v91_v20  ;;  %v77_v27 = vld [vmem:[#allocation6 + $0x28] sm:$0xff]  ;;  %v100_v29 = vld [vmem:[#allocation6 + $0xe0] sm:$0xff] }
  0x3e   :  { %v74_v26 = vld [vmem:[#allocation6 + $0x10] sm:$0xff]  ;;  %v97_v28 = vld [vmem:[#allocation6 + $0xc8] sm:$0xff]  ;;  %v80_v31 = vld [vmem:[#allocation6 + $0x40] sm:$0xff]  ;;  %v4879_v33 = vpack.c.bf16 %v93_v25, %v90_v23 }
  0x3f   :  { %v4876_v30 = vpack.c.bf16 %v77_v27, %v74_v26  ;;  %v83_v32 = vld [vmem:[#allocation6 + $0x58] sm:$0xff]  ;;  %v4885_v35 = vpack.c.bf16 %v100_v29, %v97_v28  ;;  %v96_v36 = vld [vmem:[#allocation6 + $0xc0] sm:$0xff]  ;;  %v86_v38 = vld [vmem:[#allocation6 + $0x70] sm:$0xff] }
  0x40   :  { %3634 = vmatpush1.bf16.msra.mxu0 %v4865_v16  ;;  %v4882_v34 = vpack.c.bf16 %v83_v32, %v80_v31  ;;  %v99_v37 = vld [vmem:[#allocation6 + $0xd8] sm:$0xff]  ;;  %v106_v40 = vld [vmem:[#allocation6 + $0x110] sm:$0xff]  ;;  %v89_v41 = vld [vmem:[#allocation6 + $0x88] sm:$0xff] }
  0x41   :  { %3636 = vmatprep.subr.bf16.mxu0 %v4868_v17  ;;  %3661 = vmatpush3.bf16.msra.mxu1 %v4876_v30  ;;  %v103_v39 = vld [vmem:[#allocation6 + $0xf8] sm:$0xff]  ;;  %v4889_v42 = vpack.c.bf16 %v99_v37, %v96_v36  ;;  %v102_v43 = vld [vmem:[#allocation6 + $0xf0] sm:$0xff]  ;;  %v4892_v44 = vpack.c.bf16 %v89_v41, %v86_v38  ;;  %v105_v46 = vld [vmem:[#allocation6 + $0x108] sm:$0xff] }
  0x42   :  { %3662 = vmatprep.subr.bf16.mxu1 %v5642_v0  ;;  %v4895_v45 = vpack.c.bf16 %v106_v40, %v103_v39  ;;  %v92_v47 = vld [vmem:[#allocation6 + $0xa0] sm:$0xff]  ;;  %v95_v48 = vld [vmem:[#allocation6 + $0xb8] sm:$0xff]  ;;  %v109_v49 = vld [vmem:[#allocation6 + $0x128] sm:$0xff]  ;;  %v4899_v51 = vpack.c.bf16 %v105_v46, %v102_v43 }
  0x43   :  { %v112_v50 = vld [vmem:[#allocation6 + $0x140] sm:$0xff]  ;;  %v4902_v53 = vpack.c.bf16 %v95_v48, %v92_v47  ;;  %v111_v55 = vld [vmem:[#allocation6 + $0x138] sm:$0xff]  ;;  %v98_v56 = vld [vmem:[#allocation6 + $0xd0] sm:$0xff] }
  0x44   :  { %3638 = vmatpush1.bf16.msra.mxu0 %v4871_v22  ;;  %v108_v52 = vld [vmem:[#allocation6 + $0x120] sm:$0xff]  ;;  %v4905_v54 = vpack.c.bf16 %v112_v50, %v109_v49  ;;  %v101_v57 = vld [vmem:[#allocation6 + $0xe8] sm:$0xff]  ;;  %v115_v58 = vld [vmem:[#allocation6 + $0x158] sm:$0xff] }
  0x45   :  { %3640 = vmatprep.subr.bf16.mxu0 %v4874_v24  ;;  %3664 = vmatpush3.bf16.msra.mxu1 %v4882_v34  ;;  %v118_v59 = vld [vmem:[#allocation6 + $0x170] sm:$0xff]  ;;  %v4909_v60 = vpack.c.bf16 %v111_v55, %v108_v52  ;;  %v4912_v62 = vpack.c.bf16 %v101_v57, %v98_v56  ;;  %v117_v3 = vld [vmem:[#allocation6 + $0x168] sm:$0xff]  ;;  %v104_v4 = vld [vmem:[#allocation6 + $0x100] sm:$0xff] }
  0x46   :  { %3665 = vmatprep.subr.bf16.mxu1 %v5642_v0  ;;  %v114_v61 = vld [vmem:[#allocation6 + $0x150] sm:$0xff]  ;;  %v4915_v63 = vpack.c.bf16 %v118_v59, %v115_v58  ;;  %v107_v5 = vld [vmem:[#allocation6 + $0x118] sm:$0xff]  ;;  %v121_v7 = vld [vmem:[#allocation8 + $0x8] sm:$0xff] }
  0x47   :  { %v124_v8 = vld [vmem:[#allocation8 + $0x20] sm:$0xff]  ;;  %v4919_v9 = vpack.c.bf16 %v117_v3, %v114_v61  ;;  %v4922_v13 = vpack.c.bf16 %v107_v5, %v104_v4  ;;  %v123_v15 = vld [vmem:[#allocation8 + $0x18] sm:$0xff]  ;;  %v110_v18 = vld [vmem:[#allocation6 + $0x130] sm:$0xff] }
  0x48   :  { %3642 = vmatpush1.bf16.msra.mxu0 %v4879_v33  ;;  %v120_v12 = vld [vmem:[#allocation8] sm:$0xff]  ;;  %v4925_v14 = vpack.c.bf16 %v124_v8, %v121_v7  ;;  %v113_v19 = vld [vmem:[#allocation6 + $0x148] sm:$0xff]  ;;  %v127_v20 = vld [vmem:[#allocation8 + $0x38] sm:$0xff] }
  0x49   :  { %3644 = vmatprep.subr.bf16.mxu0 %v4885_v35  ;;  %3667 = vmatpush3.bf16.msra.mxu1 %v4892_v44  ;;  %v130_v21 = vld [vmem:[#allocation8 + $0x50] sm:$0xff]  ;;  %v170_v23 = vld [vmem:[#allocation3] sm:$0xff]  ;;  %v4929_v25 = vpack.c.bf16 %v123_v15, %v120_v12  ;;  %v4932_v27 = vpack.c.bf16 %v113_v19, %v110_v18  ;;  %v129_v31 = vld [vmem:[#allocation8 + $0x48] sm:$0xff] }
  0x4a   :  { %3668 = vmatprep.subr.bf16.mxu1 %v5642_v0  ;;  %v126_v26 = vld [vmem:[#allocation8 + $0x30] sm:$0xff]  ;;  %v4937_v28 = vld [vmem:[%s5632_s1] sm:$0xff]  ;;  %v4940_v29 = vpack.c.bf16 %v130_v21, %v127_v20  ;;  %v119_v36 = vld [vmem:[#allocation6 + $0x178] sm:$0xff] }
  0x4b   :  { %5665 = vst [vmem:[#allocation14_spill] sm:$0xff] %v4937_v28  ;;  %v116_v32 = vld [vmem:[#allocation6 + $0x160] sm:$0xff]  ;;  %vm2771_vm1 = vcmp.gt.s32.totalorder %v4937_v28, 0  ;;  %vm2774_vm2 = vcmp.gt.s32.totalorder %v4937_v28, 1  ;;  %v133_v37 = vld [vmem:[#allocation8 + $0x68] sm:$0xff]  ;;  %v4947_v40 = vpack.c.bf16 %v129_v31, %v126_v26  ;;  %v135_v48 = vld [vmem:[#allocation8 + $0x78] sm:$0xff] }
  0x4c   :  { %3646 = vmatpush1.bf16.msra.mxu0 %v4889_v42  ;;  %v136_v38 = vld [vmem:[#allocation8 + $0x80] sm:$0xff]  ;;  %v509_v39 = vsel %vm2771_vm1, 1, %v5638_v2  ;;  %v4950_v43 = vpack.c.bf16 %v119_v36, %v116_v32  ;;  %v827_v46 = vsel %vm2774_vm2, 1, %v5638_v2  ;;  %v122_v49 = vld [vmem:[#allocation8 + $0x10] sm:$0xff]  ;;  %v125_v50 = vld [vmem:[#allocation8 + $0x28] sm:$0xff]  ;;  %vm2783_vm3 = vcmp.gt.s32.totalorder %v4937_v28, 4 }
  0x4d   :  { %3648 = vmatprep.subr.bf16.mxu0 %v4895_v45  ;;  %3670 = vmatpush3.bf16.msra.mxu1 %v4902_v53  ;;  %v132_v41 = vld [vmem:[#allocation8 + $0x60] sm:$0xff]  ;;  %v4954_v47 = vpack.c.bf16 %v136_v38, %v133_v37  ;;  %v139_v52 = vld [vmem:[#allocation8 + $0x98] sm:$0xff]  ;;  %v142_v55 = vld [vmem:[#allocation8 + $0xb0] sm:$0xff]  ;;  %v4963_v58 = vpack.c.bf16 %v125_v50, %v122_v49  ;;  %v1784_v59 = vsel %vm2783_vm3, 1, %v5638_v2  ;;  %vm2789_vm4 = vcmp.gt.s32.totalorder %v4937_v28, 6 }
  0x4e   :  { %3671 = vmatprep.subr.bf16.mxu1 %v5642_v0  ;;  %511 = vperm.xlu0 %4583, %v509_v39   ;;  %v4960_v56 = vpack.c.bf16 %v135_v48, %v132_v41  ;;  %v138_v57 = vld [vmem:[#allocation8 + $0x90] sm:$0xff]  ;;  %v4967_v61 = vpack.c.bf16 %v142_v55, %v139_v52  ;;  %v141_v3 = vld [vmem:[#allocation8 + $0xa8] sm:$0xff]  ;;  %v128_v4 = vld [vmem:[#allocation8 + $0x40] sm:$0xff]  ;;  %v2422_v19 = vsel %vm2789_vm4, 1, %v5638_v2 }
  0x4f   :  { %v131_v5 = vld [vmem:[#allocation8 + $0x58] sm:$0xff]  ;;  %v145_v7 = vld [vmem:[#allocation8 + $0xc8] sm:$0xff]  ;;  %v148_v8 = vld [vmem:[#allocation8 + $0xe0] sm:$0xff]  ;;  %v4972_v12 = vpack.c.bf16 %v141_v3, %v138_v57 }
  0x50   :  { %3650 = vmatpush1.bf16.msra.mxu0 %v4899_v51  ;;  %v144_v15 = vld [vmem:[#allocation8 + $0xc0] sm:$0xff]  ;;  %v4975_v18 = vpack.c.bf16 %v131_v5, %v128_v4  ;;  %v4979_v20 = vpack.c.bf16 %v148_v8, %v145_v7  ;;  %v147_v21 = vld [vmem:[#allocation8 + $0xd8] sm:$0xff]  ;;  %v137_v26 = vld [vmem:[#allocation8 + $0x88] sm:$0xff] }
  0x51   :  { %3652 = vmatprep.subr.bf16.mxu0 %v4905_v54  ;;  %3673 = vmatpush3.bf16.msra.mxu1 %v4912_v62  ;;  %v151_v31 = vld [vmem:[#allocation8 + $0xf8] sm:$0xff]  ;;  %v154_v32 = vld [vmem:[#allocation8 + $0x110] sm:$0xff]  ;;  %v4985_v36 = vpack.c.bf16 %v147_v21, %v144_v15  ;;  %v153_v41 = vld [vmem:[#allocation8 + $0x108] sm:$0xff] }
  0x52   :  { %3674 = vmatprep.subr.bf16.mxu1 %v5642_v0  ;;  %829 = vperm.xlu0 %4583, %v827_v46   ;;  %v150_v37 = vld [vmem:[#allocation8 + $0xf0] sm:$0xff]  ;;  %v4991_v39 = vpack.c.bf16 %v154_v32, %v151_v31  ;;  %v140_v46 = vld [vmem:[#allocation8 + $0xa0] sm:$0xff]  ;;  %v143_v48 = vld [vmem:[#allocation8 + $0xb8] sm:$0xff] }
  0x53   :  { %v157_v49 = vld [vmem:[#allocation8 + $0x128] sm:$0xff]  ;;  %v160_v50 = vld [vmem:[#allocation8 + $0x140] sm:$0xff]  ;;  %v4995_v52 = vpack.c.bf16 %v153_v41, %v150_v37  ;;  %v4998_v57 = vpack.c.bf16 %v143_v48, %v140_v46  ;;  %v159_v3 = vld [vmem:[#allocation8 + $0x138] sm:$0xff] }
  0x54   :  { %3654 = vmatpush1.bf16.msra.mxu0 %v4909_v60  ;;  %v156_v55 = vld [vmem:[#allocation8 + $0x120] sm:$0xff]  ;;  %v146_v4 = vld [vmem:[#allocation8 + $0xd0] sm:$0xff]  ;;  %v149_v5 = vld [vmem:[#allocation8 + $0xe8] sm:$0xff] }
  0x55   :  { %3656 = vmatprep.subr.bf16.mxu0 %v4915_v63  ;;  %3676 = vmatpush3.bf16.msra.mxu1 %v4922_v13  ;;  %v163_v7 = vld [vmem:[#allocation8 + $0x158] sm:$0xff]  ;;  %v166_v8 = vld [vmem:[#allocation8 + $0x170] sm:$0xff]  ;;  %v5005_v15 = vpack.c.bf16 %v159_v3, %v156_v55  ;;  %v5008_v21 = vpack.c.bf16 %v149_v5, %v146_v4  ;;  %v152_v31 = vld [vmem:[#allocation8 + $0x100] sm:$0xff] }
  0x56   :  { %3677 = vmatprep.subr.bf16.mxu1 %v5642_v0  ;;  %1786 = vperm.xlu0 %4583, %v1784_v59   ;;  %v5001_v59 = vpack.c.bf16 %v160_v50, %v157_v49  ;;  %v155_v32 = vld [vmem:[#allocation8 + $0x118] sm:$0xff]  ;;  %v158_v46 = vld [vmem:[#allocation8 + $0x130] sm:$0xff]  ;;  %v161_v48 = vld [vmem:[#allocation8 + $0x148] sm:$0xff] }
  0x57   :  { %5667 = vst [vmem:[#allocation16_spill] sm:$0xff] %v5005_v15  ;;  %v5018_v41 = vpack.c.bf16 %v155_v32, %v152_v31  ;;  %v5024_v49 = vpack.c.bf16 %v161_v48, %v158_v46  ;;  %v164_v50 = vld [vmem:[#allocation8 + $0x160] sm:$0xff]  ;;  %v167_v55 = vld [vmem:[#allocation8 + $0x178] sm:$0xff]  ;;  %v519_v4 = vld [vmem:[#allocation3 + $0x8] sm:$0xff] }
  0x58   :  { %3658 = vmatpush1.bf16.msra.mxu0 %v4919_v9  ;;  %5666 = vst [vmem:[#allocation15_spill] sm:$0xff] %v5001_v59  ;;  %v5030_v3 = vpack.c.bf16 %v167_v55, %v164_v50  ;;  %v169_v31 = vld [vmem:[%s5636_s5] sm:$0x7] }
  0x59   :  { %3684 = vmatprep.subr.bf16.mxu0 %v4925_v14  ;;  %3679 = vmatpush3.bf16.msra.mxu1 %v4932_v27  ;;  %5670 = vst [vmem:[#allocation19_spill] sm:$0xff] %v5018_v41  ;;  %5671 = vst [vmem:[#allocation20_spill] sm:$0xff] %v5024_v49  ;;  %v168_v32 = vld [vmem:[%s5635_s4] sm:$0x7]  ;;  %s4770_s4 = smov [#allocation9]  }
  0x5a   :  { %3680 = vmatprep.subr.bf16.mxu1 %v5642_v0  ;;  %2424 = vperm.xlu0 %4583, %v2422_v19   ;;  %v162_v19 = vld [vmem:[#allocation8 + $0x150] sm:$0xff]  ;;  %5672 = vst [vmem:[#allocation21_spill] sm:$0xff] %v5030_v3  ;;  %s2756_s5 = sshll.u32 %s4770_s4, 4  ;;  %s2757_s5 = int_to_ptr.vmem [resolvable:$true] %s2756_s5 }
  0x5b   :  { %253 = vmatmul.mubr.f32.vlgmr.msra.gmra.mrb[0].mxu0 %v170_v23  ;;  %s4731_s15 = scalar_lea.vmem %s2757_s5, 1024  ;;  %p4736_p11 = scmp.lt.s32.totalorder %s2757_s5, %s2757_s5 }
  0x5c   :  { %3686 = vmatpush1.bf16.msra.mxu0 %v4929_v25  ;;  %409 = vmatprep.mubr.f32.mxu0 %v5640_v1  ;;  %p4732_p10 = scmp.ne.s32.totalorder %s2757_s5, %s4731_s15  ;;  %p4737_p12 = scmp.lt.s32.totalorder %s4731_s15, %s4731_s15 }
  0x5d   :  { %3688 = vmatprep.subr.bf16.mxu0 %v4940_v29  ;;  %3682 = vmatpush3.bf16.msra.mxu1 %v4950_v43 }
  0x5e   :  { %3715 = vmatprep.subr.bf16.mxu1 %v5642_v0  ;;  %p4738_p13 = por %p4737_p12, %p4736_p11 }
  0x60   :  { %3690 = vmatpush1.bf16.msra.mxu0 %v4947_v40  ;;  %3100 = vmatmul.mubr.f32.vlgmr.msra.gmra.mrb[0].mxu1 %v170_v23  ;;  %v134_v23 = vld [vmem:[#allocation8 + $0x70] sm:$0xff]  ;;  %p4739_p0 = pnand %p4738_p13, %p4732_p10 }
  0x61   :  { %3692 = vmatprep.subr.bf16.mxu0 %v4954_v47  ;;  %3717 = vmatpush3.bf16.msra.mxu1 %v4963_v58  ;;  %v4988_v38 = vpack.c.bf16 %v137_v26, %v134_v23  ;;  %v5011_v23 = vpack.c.bf16 %v166_v8, %v163_v7  ;;  %v165_v26 = vld [vmem:[#allocation8 + $0x168] sm:$0xff]  ;;  %v173_v8 = vlaneseq }
  0x62   :  { %3718 = vmatprep.subr.bf16.mxu1 %v5642_v0  ;;  %3134 = vmatprep.mubr.msk.f32.mxu1 %vm4768_vm0, %v5640_v1  ;;  %v5015_v37 = vpack.c.bf16 %v165_v26, %v162_v19 }
  0x63   :  { %5668 = vst [vmem:[#allocation17_spill] sm:$0xff] %v5011_v23  ;;  %v174_v19 = vshrl.u32 %v173_v8, 7 }
  0x64   :  { %3694 = vmatpush1.bf16.msra.mxu0 %v4960_v56  ;;  %5669 = vst [vmem:[#allocation18_spill] sm:$0xff] %v5015_v37 }
  0x65   :  { %3696 = vmatprep.subr.bf16.mxu0 %v4967_v61  ;;  %3720 = vmatpush3.bf16.msra.mxu1 %v4975_v18  ;;  %v175_v26 = vsub.s32 0, %v174_v19  ;;  %v179_v46 = vsub.s32 1, %v174_v19 }
  0x66   :  { %3721 = vmatprep.subr.bf16.mxu1 %v5642_v0 }
  0x67   :  { %v176_v48 = vrot.slane %v168_v32, %v175_v26  ;;  %v333_v50 = vrot.slane %v169_v31, %v175_v26  ;;  %v180_v55 = vrot.slane %v168_v32, %v179_v46 }
  0x68   :  { %3698 = vmatpush1.bf16.msra.mxu0 %v4972_v12 }
  0x69   :  { %3700 = vmatprep.subr.bf16.mxu0 %v4979_v20  ;;  %3723 = vmatpush3.bf16.msra.mxu1 %v4988_v38  ;;  %v5112_v2 = vadd.f32 %v333_v50, %v176_v48 }
  0x6a   :  { %3724 = vmatprep.subr.bf16.mxu1 %v5642_v0 }
  0x6c   :  { %3702 = vmatpush1.bf16.msra.mxu0 %v4985_v36 }
  0x6d   :  { %3704 = vmatprep.subr.bf16.mxu0 %v4991_v39  ;;  %3726 = vmatpush3.bf16.msra.mxu1 %v4998_v57 }
  0x6e   :  { %3727 = vmatprep.subr.bf16.mxu1 %v5642_v0 }
  0x70   :  { %3706 = vmatpush1.bf16.msra.mxu0 %v4995_v52 }
  0x71   :  { %3708 = vmatprep.subr.bf16.mxu0 %v5001_v59  ;;  %3729 = vmatpush3.bf16.msra.mxu1 %v5008_v21 }
  0x72   :  { %3730 = vmatprep.subr.bf16.mxu1 %v5642_v0 }
  0x74   :  { %3710 = vmatpush1.bf16.msra.mxu0 %v5005_v15 }
  0x75   :  { %3712 = vmatprep.subr.bf16.mxu0 %v5011_v23  ;;  %3732 = vmatpush3.bf16.msra.mxu1 %v5018_v41 }
  0x76   :  { %3733 = vmatprep.subr.bf16.mxu1 %v5642_v0 }
  0x78   :  { %3714 = vmatpush1.bf16.msra.mxu0 %v5015_v37 }
  0x79   :  { %3740 = vmatprep.subr.bf16.mxu0 %v4857_v6  ;;  %3735 = vmatpush3.bf16.msra.mxu1 %v5024_v49 }
  0x7a   :  { %3736 = vmatprep.subr.bf16.mxu1 %v5642_v0 }
  0x7b   :  { %410 = vmatmul.mubr.f32.vlgmr.msra.gmra.mrb[0].mxu0 %v5640_v1 }
  0x7c   :  { %3742 = vmatpush1.bf16.msra.mxu0 %v4859_v10  ;;  %585 = vmatprep.mubr.f32.mxu0 %v5640_v1 }
  0x7d   :  { %3744 = vmatprep.subr.bf16.mxu0 %v4861_v11  ;;  %3738 = vmatpush3.bf16.msra.mxu1 %v5030_v3 }
  0x7e   :  { %3771 = vmatprep.subr.bf16.mxu1 %v5642_v0 }
  0x80   :  { %3746 = vmatpush1.bf16.msra.mxu0 %v4865_v16  ;;  %3135 = vmatmul.mubr.f32.vlgmr.msra.gmra.mrb[2].mxu1 %v5640_v1 }
  0x81   :  { %3748 = vmatprep.subr.bf16.mxu0 %v4868_v17  ;;  %3773 = vmatpush3.bf16.msra.mxu1 %v4876_v30 }
  0x82   :  { %3774 = vmatprep.subr.bf16.mxu1 %v5642_v0  ;;  %3169 = vmatprep.mubr.msk.f32.mxu1 %vm4768_vm0, %v5640_v1 }
  0x84   :  { %3750 = vmatpush1.bf16.msra.mxu0 %v4871_v22 }
  0x85   :  { %3752 = vmatprep.subr.bf16.mxu0 %v4874_v24  ;;  %3776 = vmatpush3.bf16.msra.mxu1 %v4882_v34 }
  0x86   :  { %3777 = vmatprep.subr.bf16.mxu1 %v5642_v0 }
  0x88   :  { %3754 = vmatpush1.bf16.msra.mxu0 %v4879_v33 }
  0x89   :  { %3756 = vmatprep.subr.bf16.mxu0 %v4885_v35  ;;  %3779 = vmatpush3.bf16.msra.mxu1 %v4892_v44 }
  0x8a   :  { %3780 = vmatprep.subr.bf16.mxu1 %v5642_v0 }
  0x8c   :  { %3758 = vmatpush1.bf16.msra.mxu0 %v4889_v42 }
  0x8d   :  { %3760 = vmatprep.subr.bf16.mxu0 %v4895_v45  ;;  %3782 = vmatpush3.bf16.msra.mxu1 %v4902_v53 }
  0x8e   :  { %3783 = vmatprep.subr.bf16.mxu1 %v5642_v0 }
  0x90   :  { %3762 = vmatpush1.bf16.msra.mxu0 %v4899_v51 }
  0x91   :  { %3764 = vmatprep.subr.bf16.mxu0 %v4905_v54  ;;  %3785 = vmatpush3.bf16.msra.mxu1 %v4912_v62 }
  0x92   :  { %3786 = vmatprep.subr.bf16.mxu1 %v5642_v0 }
  0x94   :  { %3766 = vmatpush1.bf16.msra.mxu0 %v4909_v60 }
  0x95   :  { %3768 = vmatprep.subr.bf16.mxu0 %v4915_v63  ;;  %3788 = vmatpush3.bf16.msra.mxu1 %v4922_v13 }
  0x96   :  { %3789 = vmatprep.subr.bf16.mxu1 %v5642_v0 }
  0x98   :  { %3770 = vmatpush1.bf16.msra.mxu0 %v4919_v9 }
  0x99   :  { %3796 = vmatprep.subr.bf16.mxu0 %v4925_v14  ;;  %3791 = vmatpush3.bf16.msra.mxu1 %v4932_v27 }
  0x9a   :  { %3792 = vmatprep.subr.bf16.mxu1 %v5642_v0 }
  0x9b   :  { %586 = vmatmul.mubr.f32.vlgmr.msra.gmra.mrb[2].mxu0 %v519_v4 }
  0x9c   :  { %3798 = vmatpush1.bf16.msra.mxu0 %v4929_v25  ;;  %726 = vmatprep.mubr.f32.mxu0 %v5640_v1 }
  0x9d   :  { %3794 = vmatpush3.bf16.msra.mxu1 %v4950_v43  ;;  %3800 = vmatprep.subr.bf16.mxu0 %v4940_v29 }
  0x9e   :  { %3827 = vmatprep.subr.bf16.mxu1 %v5642_v0 }
  0xa0   :  { %3170 = vmatmul.mubr.f32.vlgmr.msra.gmra.mrb[4].mxu1 %v519_v4  ;;  %3802 = vmatpush1.bf16.msra.mxu0 %v4947_v40  ;;  %v337_v4 = vrot.slane %v169_v31, %v179_v46  ;;  %v183_v46 = vsub.s32 2, %v174_v19 }
  0xa1   :  { %3829 = vmatpush3.bf16.msra.mxu1 %v4963_v58  ;;  %3204 = vmatprep.mubr.msk.f32.mxu1 %vm4768_vm0, %v5640_v1 }
  0xa2   :  { %3830 = vmatprep.subr.bf16.mxu1 %v5642_v0  ;;  %3804 = vmatprep.subr.bf16.mxu0 %v4954_v47  ;;  %v5118_v48 = vrot.slane %v169_v31, %v183_v46 }
  0xa4   :  { %3806 = vmatpush1.bf16.msra.mxu0 %v4960_v56 }
  0xa5   :  { %3832 = vmatpush3.bf16.msra.mxu1 %v4975_v18  ;;  %3808 = vmatprep.subr.bf16.mxu0 %v4967_v61 }
  0xa6   :  { %3833 = vmatprep.subr.bf16.mxu1 %v5642_v0 }
  0xa8   :  { %3810 = vmatpush1.bf16.msra.mxu0 %v4972_v12 }
  0xa9   :  { %3835 = vmatpush3.bf16.msra.mxu1 %v4988_v38  ;;  %3812 = vmatprep.subr.bf16.mxu0 %v4979_v20 }
  0xaa   :  { %3836 = vmatprep.subr.bf16.mxu1 %v5642_v0 }
  0xac   :  { %3814 = vmatpush1.bf16.msra.mxu0 %v4985_v36 }
  0xad   :  { %3838 = vmatpush3.bf16.msra.mxu1 %v4998_v57  ;;  %3816 = vmatprep.subr.bf16.mxu0 %v4991_v39 }
  0xae   :  { %3839 = vmatprep.subr.bf16.mxu1 %v5642_v0 }
  0xb0   :  { %3818 = vmatpush1.bf16.msra.mxu0 %v4995_v52 }
  0xb1   :  { %3841 = vmatpush3.bf16.msra.mxu1 %v5008_v21  ;;  %3820 = vmatprep.subr.bf16.mxu0 %v5001_v59 }
  0xb2   :  { %3842 = vmatprep.subr.bf16.mxu1 %v5642_v0 }
  0xb4   :  { %3822 = vmatpush1.bf16.msra.mxu0 %v5005_v15 }
  0xb5   :  { %3844 = vmatpush3.bf16.msra.mxu1 %v5018_v41  ;;  %3824 = vmatprep.subr.bf16.mxu0 %v5011_v23 }
  0xb6   :  { %3845 = vmatprep.subr.bf16.mxu1 %v5642_v0 }
  0xb8   :  { %3826 = vmatpush1.bf16.msra.mxu0 %v5015_v37 }
  0xb9   :  { %3847 = vmatpush3.bf16.msra.mxu1 %v5024_v49  ;;  %3852 = vmatprep.subr.bf16.mxu0 %v4857_v6 }
  0xba   :  { %3848 = vmatprep.subr.bf16.mxu1 %v5642_v0 }
  0xbd   :  { %3850 = vmatpush3.bf16.msra.mxu1 %v5030_v3 }
  0xbe   :  { %3883 = vmatprep.subr.bf16.mxu1 %v5642_v0 }
  0xcd   :  { %v512_v31 = vpop.permute.xlu0 %511 }
  0xce   :  { %vm513_vm5 = vcmp.eq.s32.totalorder %v512_v31, 1 }
 0x133   :  { %v325_v5 = vpop.f32.mrb[0].mxu1 }
 0x134   :  { %v3101_v7 = vpop.f32.mrb[1].mxu1 }
 0x135   :  { %v5114_v7 = vadd.f32 %v337_v4, %v180_v55  ;;  %v5120_v55 = vrot.slane %v168_v32, %v183_v46 }
 0x137   :  { %5673 = vst [vmem:[#allocation22_spill] sm:$0xff] %v5114_v7 }
 0x14e   :  { %v411_v1 = vpop.f32.mrb[0].mxu0 }
 0x14f   :  { %v4524_v8 = vadd.f32 %v5112_v2, %v411_v1  ;;  %v413_v0 = vpop.f32.mrb[1].mxu0 }
 0x150   :  { %v4526_v6 = vadd.f32 %v5114_v7, %v413_v0  ;;  %v326_v0 = vadd.f32 %v325_v5, %v5120_v55  ;;  %v5675_v5 = vmov 0.0  }
 0x151   :  { %v2769_v28 = vmul.f32 -1.442695, %v4524_v8 }
 0x152   :  { %v2770_v3 = vmul.f32 -1.442695, %v4526_v6 }
 0x153   :  { %4585 = vpow2.f32 %v2769_v28  ;;  %v482_v37 = vpop.f32.mrb[2].mxu1 }
 0x154   :  { %v3136_v23 = vpop.f32.mrb[3].mxu1  ;;  %4587 = vpow2.f32 %v2770_v3  ;;  %v483_v1 = vadd.f32 %v482_v37, %v5118_v48  ;;  %v5674_v37 = vmov 0.0|0.0  }
 0x15d   :  { %v4586_v49 = vpop.eup %4585 }
 0x15e   :  { %v490_v26 = vadd.f32 1.0, %v4586_v49  ;;  %v4588_v50 = vpop.eup %4587 }
 0x15f   :  { %v497_v4 = vadd.f32 1.0, %v4588_v50  ;;  %v838_v50 = vld [vmem:[#allocation3 + $0x10] sm:$0xff] }
 0x160   :  { %4589 = vrcp.f32 %v490_v26 }
 0x161   :  { %4591 = vrcp.f32 %v497_v4  ;;  %v5676_v4 = vld [vmem:[#allocation20_spill] sm:$0xff] }
 0x16a   :  { %v4590_v8 = vpop.eup %4589 }
 0x16b   :  { %v500_v6 = vmul.f32 %v4590_v8, %v483_v1  ;;  %v4592_v23 = vpop.eup %4591  ;;  %v5677_v1 = vld [vmem:[#allocation17_spill] sm:$0xff]  ;;  %v5678_v8 = vld [vmem:[#allocation18_spill] sm:$0xff] }
 0x16c   :  { %v503_v3 = vsub.f32 1.0, %v4592_v23  ;;  %v505_v19 = vmul.f32 0.0, %v4592_v23  ;;  %v5682_v23 = vmov 0  }
 0x16d   :  { %v501_v28 = vadd.f32 %v500_v6, %v326_v0  ;;  %v5679_v0 = vld [vmem:[#allocation21_spill] sm:$0xff] }
 0x16e   :  { %v5680_v6 = vld [vmem:[#allocation13_spill] sm:$0xff] }
 0x16f   :  { %4593 = vtanh.f32 %v501_v28  ;;  %v5681_v28 = vld [vmem:[#allocation14_spill] sm:$0xff] }
 0x170   :  { %vm2777_vm6 = vcmp.gt.s32.totalorder %v5681_v28, 2  ;;  %vm2780_vm7 = vcmp.gt.s32.totalorder %v5681_v28, 3  ;;  %vm2786_vm8 = vcmp.gt.s32.totalorder %v5681_v28, 5  ;;  %vm2792_vm9 = vcmp.gt.s32.totalorder %v5681_v28, 7 }
 0x179   :  { %v4594_v49 = vpop.eup %4593 }
 0x17a   :  { %v504_v26 = vmul.f32 %v4594_v49, %v503_v3  ;;  %v1146_v3 = vsel %vm2777_vm6, 1, %v5682_v23  ;;  %v1465_v49 = vsel %vm2780_vm7, 1, %v5682_v23 }
 0x17b   :  { %1148 = vperm.xlu1 %4584, %v1146_v3  }
 0x17c   :  { %v506_v7 = vadd.f32 %v505_v19, %v504_v26  ;;  %v2103_v26 = vsel %vm2786_vm8, 1, %v5682_v23  ;;  %v2741_v19 = vsel %vm2792_vm9, 1, %v5682_v23 }
 0x17e   :  { %v5124_v32 = vsel %vm513_vm5, %v506_v7, 0.0  ;;  %2793 = vmatmul.mubr.msk.f32.vlgmr.msra.gmra.mrb[2].mxu0 %vm513_vm5, %v506_v7  ;;  %3205 = vmatmul.mubr.msk.f32.vlgmr.msra.gmra.mrb[6].mxu1 %vm513_vm5, %v506_v7  ;;  %v5162_v7 = vpop.f32.mrb[4].mxu1 }
 0x17f   :  { %517 = vst [vmem:[#allocation9] sm:$0xff] %v5124_v32  ;;  %3854 = vmatpush1.bf16.msra.mxu0 %v4859_v10  ;;  %3885 = vmatpush3.bf16.msra.mxu1 %v4876_v30  ;;  %v3171_v46 = vpop.f32.mrb[5].mxu1 }
 0x180   :  { %3856 = vmatprep.subr.bf16.mxu0 %v4861_v11  ;;  %3886 = vmatprep.subr.bf16.mxu1 %v5674_v37 }
 0x181   :  { %904 = vmatprep.mubr.f32.mxu0 %v5675_v5  ;;  %3239 = vmatprep.mubr.msk.f32.mxu1 %vm4768_vm0, %v5675_v5 }
 0x182   :  { %1467 = vperm.xlu1 %4584, %v1465_v49  }
 0x183   :  { %3858 = vmatpush1.bf16.msra.mxu0 %v4865_v16  ;;  %3888 = vmatpush3.bf16.msra.mxu1 %v4882_v34 }
 0x184   :  { %3860 = vmatprep.subr.bf16.mxu0 %v4868_v17  ;;  %3889 = vmatprep.subr.bf16.mxu1 %v5674_v37 }
 0x186   :  { %2105 = vperm.xlu1 %4584, %v2103_v26  }
 0x187   :  { %3862 = vmatpush1.bf16.msra.mxu0 %v4871_v22  ;;  %3891 = vmatpush3.bf16.msra.mxu1 %v4892_v44 }
 0x188   :  { %3864 = vmatprep.subr.bf16.mxu0 %v4874_v24  ;;  %3892 = vmatprep.subr.bf16.mxu1 %v5674_v37 }
 0x18a   :  { %2743 = vperm.xlu1 %4584, %v2741_v19  }
 0x18b   :  { %3866 = vmatpush1.bf16.msra.mxu0 %v4879_v33  ;;  %3894 = vmatpush3.bf16.msra.mxu1 %v4902_v53 }
 0x18c   :  { %3868 = vmatprep.subr.bf16.mxu0 %v4885_v35  ;;  %3895 = vmatprep.subr.bf16.mxu1 %v5674_v37 }
 0x18f   :  { %3870 = vmatpush1.bf16.msra.mxu0 %v4889_v42  ;;  %3897 = vmatpush3.bf16.msra.mxu1 %v4912_v62 }
 0x190   :  { %3872 = vmatprep.subr.bf16.mxu0 %v4895_v45  ;;  %3898 = vmatprep.subr.bf16.mxu1 %v5674_v37 }
 0x193   :  { %3874 = vmatpush1.bf16.msra.mxu0 %v4899_v51  ;;  %3900 = vmatpush3.bf16.msra.mxu1 %v4922_v13 }
 0x194   :  { %3876 = vmatprep.subr.bf16.mxu0 %v4905_v54  ;;  %3901 = vmatprep.subr.bf16.mxu1 %v5674_v37 }
 0x197   :  { %3878 = vmatpush1.bf16.msra.mxu0 %v4909_v60  ;;  %3903 = vmatpush3.bf16.msra.mxu1 %v4932_v27 }
 0x198   :  { %3880 = vmatprep.subr.bf16.mxu0 %v4915_v63  ;;  %3904 = vmatprep.subr.bf16.mxu1 %v5674_v37 }
 0x19b   :  { %3882 = vmatpush1.bf16.msra.mxu0 %v4919_v9  ;;  %3906 = vmatpush3.bf16.msra.mxu1 %v4950_v43 }
 0x19c   :  { %3908 = vmatprep.subr.bf16.mxu0 %v4925_v14  ;;  %3939 = vmatprep.subr.bf16.mxu1 %v5674_v37 }
 0x19e   :  { %905 = vmatmul.mubr.f32.vlgmr.msra.gmra.mrb[4].mxu0 %v838_v50  ;;  %3240 = vmatmul.mubr.f32.vlgmr.msra.gmra.mrb[8].mxu1 %v838_v50 }
 0x19f   :  { %3910 = vmatpush1.bf16.msra.mxu0 %v4929_v25  ;;  %3941 = vmatpush3.bf16.msra.mxu1 %v4963_v58 }
 0x1a0   :  { %3912 = vmatprep.subr.bf16.mxu0 %v4940_v29  ;;  %3942 = vmatprep.subr.bf16.mxu1 %v5674_v37 }
 0x1a1   :  { %1045 = vmatprep.mubr.f32.mxu0 %v5675_v5  ;;  %3274 = vmatprep.mubr.msk.f32.mxu1 %vm4768_vm0, %v5675_v5 }
 0x1a3   :  { %3914 = vmatpush1.bf16.msra.mxu0 %v4947_v40  ;;  %3944 = vmatpush3.bf16.msra.mxu1 %v4975_v18 }
 0x1a4   :  { %3916 = vmatprep.subr.bf16.mxu0 %v4954_v47  ;;  %3945 = vmatprep.subr.bf16.mxu1 %v5674_v37 }
 0x1a7   :  { %3918 = vmatpush1.bf16.msra.mxu0 %v4960_v56  ;;  %3947 = vmatpush3.bf16.msra.mxu1 %v4988_v38 }
 0x1a8   :  { %3920 = vmatprep.subr.bf16.mxu0 %v4967_v61  ;;  %3948 = vmatprep.subr.bf16.mxu1 %v5674_v37 }
 0x1ab   :  { %3922 = vmatpush1.bf16.msra.mxu0 %v4972_v12  ;;  %3950 = vmatpush3.bf16.msra.mxu1 %v4998_v57 }
 0x1ac   :  { %3924 = vmatprep.subr.bf16.mxu0 %v4979_v20  ;;  %3951 = vmatprep.subr.bf16.mxu1 %v5674_v37 }
 0x1af   :  { %3926 = vmatpush1.bf16.msra.mxu0 %v4985_v36  ;;  %3953 = vmatpush3.bf16.msra.mxu1 %v5008_v21 }
 0x1b0   :  { %3928 = vmatprep.subr.bf16.mxu0 %v4991_v39  ;;  %3954 = vmatprep.subr.bf16.mxu1 %v5674_v37 }
 0x1b3   :  { %3930 = vmatpush1.bf16.msra.mxu0 %v4995_v52  ;;  %3956 = vmatpush3.bf16.msra.mxu1 %v5018_v41 }
 0x1b4   :  { %3932 = vmatprep.subr.bf16.mxu0 %v5001_v59  ;;  %3957 = vmatprep.subr.bf16.mxu1 %v5674_v37  ;;  %v659_v59 = vadd.f32 %v5162_v7, %v5120_v55  ;;  %v1157_v7 = vld [vmem:[#allocation3 + $0x18] sm:$0xff] }
 0x1b7   :  { %3934 = vmatpush1.bf16.msra.mxu0 %v5005_v15  ;;  %3959 = vmatpush3.bf16.msra.mxu1 %v5676_v4 }
 0x1b8   :  { %3936 = vmatprep.subr.bf16.mxu0 %v5677_v1  ;;  %3960 = vmatprep.subr.bf16.mxu1 %v5674_v37 }
 0x1bb   :  { %3938 = vmatpush1.bf16.msra.mxu0 %v5678_v8  ;;  %3962 = vmatpush3.bf16.msra.mxu1 %v5679_v0  ;;  %v5683_v8 = vld [vmem:[#allocation22_spill] sm:$0xff] }
 0x1bc   :  { %3964 = vmatprep.subr.bf16.mxu0 %v5680_v6  ;;  %3995 = vmatprep.subr.bf16.mxu1 %v5674_v37 }
 0x251   :  { %v728_v31 = vpop.f32.mrb[2].mxu0  ;;  %v799_v46 = vpop.f32.mrb[6].mxu1 }
 0x252   :  { %v4528_v50 = vadd.f32 %v5112_v2, %v728_v31  ;;  %v730_v6 = vpop.f32.mrb[3].mxu0  ;;  %v3206_v0 = vpop.f32.mrb[7].mxu1  ;;  %v800_v23 = vadd.f32 %v799_v46, %v5118_v48 }
 0x253   :  { %v4530_v1 = vadd.f32 %v5683_v8, %v730_v6 }
 0x254   :  { %v2772_v3 = vmul.f32 -1.442695, %v4528_v50 }
 0x255   :  { %v2773_v4 = vmul.f32 -1.442695, %v4530_v1 }
 0x256   :  { %4595 = vpow2.f32 %v2772_v3 }
 0x257   :  { %4597 = vpow2.f32 %v2773_v4 }
 0x260   :  { %v4596_v49 = vpop.eup %4595 }
 0x261   :  { %v807_v15 = vadd.f32 1.0, %v4596_v49  ;;  %v4598_v28 = vpop.eup %4597  ;;  %v830_v49 = vpop.permute.xlu0 %829 }
 0x262   :  { %v814_v26 = vadd.f32 1.0, %v4598_v28  ;;  %vm831_vm10 = vcmp.eq.s32.totalorder %v830_v49, 1 }
 0x263   :  { %4599 = vrcp.f32 %v807_v15 }
 0x264   :  { %4601 = vrcp.f32 %v814_v26  ;;  %v5684_v26 = vld [vmem:[#allocation15_spill] sm:$0xff] }
 0x26d   :  { %v4600_v19 = vpop.eup %4599 }
 0x26e   :  { %v817_v31 = vmul.f32 %v4600_v19, %v800_v23  ;;  %v4602_v50 = vpop.eup %4601  ;;  %v5685_v23 = vld [vmem:[#allocation16_spill] sm:$0xff] }
 0x26f   :  { %v820_v6 = vsub.f32 1.0, %v4602_v50  ;;  %v822_v4 = vmul.f32 %v4602_v50, %v5124_v32  ;;  %v5686_v19 = vld [vmem:[#allocation20_spill] sm:$0xff]  ;;  %v5689_v50 = vld [vmem:[#allocation21_spill] sm:$0xff] }
 0x270   :  { %v818_v0 = vadd.f32 %v817_v31, %v659_v59  ;;  %v5687_v31 = vld [vmem:[#allocation17_spill] sm:$0xff] }
 0x271   :  { %v977_v59 = vpop.f32.mrb[8].mxu1 }
 0x272   :  { %4603 = vtanh.f32 %v818_v0  ;;  %v5688_v0 = vld [vmem:[#allocation18_spill] sm:$0xff] }
 0x27c   :  { %v4604_v3 = vpop.eup %4603 }
 0x27d   :  { %v821_v1 = vmul.f32 %v4604_v3, %v820_v6  ;;  %v5690_v6 = vld [vmem:[#allocation13_spill] sm:$0xff] }
 0x27f   :  { %v823_v15 = vadd.f32 %v822_v4, %v821_v1 }
 0x281   :  { %v5214_v28 = vsel %vm831_vm10, %v823_v15, %v5124_v32  ;;  %v834_v46 = vsel %vm831_vm10, %v823_v15, 0.0  ;;  %v3241_v32 = vpop.f32.mrb[9].mxu1 }
 0x282   :  { %836 = vst [vmem:[#allocation9 + $0x8] sm:$0xff] %v834_v46  ;;  %1046 = vmatmul.mubr.f32.vlgmr.msra.gmra.mrb[4].mxu0 %v5214_v28  ;;  %3275 = vmatmul.mubr.f32.vlgmr.msra.gmra.mrb[10].mxu1 %v5214_v28 }
 0x283   :  { %3966 = vmatpush1.bf16.msra.mxu0 %v4859_v10  ;;  %3997 = vmatpush3.bf16.msra.mxu1 %v4876_v30 }
 0x284   :  { %3968 = vmatprep.subr.bf16.mxu0 %v4861_v11  ;;  %3998 = vmatprep.subr.bf16.mxu1 %v5674_v37 }
 0x285   :  { %1223 = vmatprep.mubr.f32.mxu0 %v5675_v5  ;;  %3309 = vmatprep.mubr.msk.f32.mxu1 %vm4768_vm0, %v5675_v5 }
 0x287   :  { %3970 = vmatpush1.bf16.msra.mxu0 %v4865_v16  ;;  %4000 = vmatpush3.bf16.msra.mxu1 %v4882_v34 }
 0x288   :  { %3972 = vmatprep.subr.bf16.mxu0 %v4868_v17  ;;  %4001 = vmatprep.subr.bf16.mxu1 %v5674_v37 }
 0x28b   :  { %3974 = vmatpush1.bf16.msra.mxu0 %v4871_v22  ;;  %4003 = vmatpush3.bf16.msra.mxu1 %v4892_v44 }
 0x28c   :  { %3976 = vmatprep.subr.bf16.mxu0 %v4874_v24  ;;  %4004 = vmatprep.subr.bf16.mxu1 %v5674_v37 }
 0x28f   :  { %3978 = vmatpush1.bf16.msra.mxu0 %v4879_v33  ;;  %4006 = vmatpush3.bf16.msra.mxu1 %v4902_v53 }
 0x290   :  { %3980 = vmatprep.subr.bf16.mxu0 %v4885_v35  ;;  %4007 = vmatprep.subr.bf16.mxu1 %v5674_v37 }
 0x293   :  { %3982 = vmatpush1.bf16.msra.mxu0 %v4889_v42  ;;  %4009 = vmatpush3.bf16.msra.mxu1 %v4912_v62 }
 0x294   :  { %3984 = vmatprep.subr.bf16.mxu0 %v4895_v45  ;;  %4010 = vmatprep.subr.bf16.mxu1 %v5674_v37 }
 0x297   :  { %3986 = vmatpush1.bf16.msra.mxu0 %v4899_v51  ;;  %4012 = vmatpush3.bf16.msra.mxu1 %v4922_v13 }
 0x298   :  { %3988 = vmatprep.subr.bf16.mxu0 %v4905_v54  ;;  %4013 = vmatprep.subr.bf16.mxu1 %v5674_v37 }
 0x29b   :  { %3990 = vmatpush1.bf16.msra.mxu0 %v4909_v60  ;;  %4015 = vmatpush3.bf16.msra.mxu1 %v4932_v27 }
 0x29c   :  { %3992 = vmatprep.subr.bf16.mxu0 %v4915_v63  ;;  %4016 = vmatprep.subr.bf16.mxu1 %v5674_v37 }
 0x29f   :  { %3994 = vmatpush1.bf16.msra.mxu0 %v4919_v9  ;;  %4018 = vmatpush3.bf16.msra.mxu1 %v4950_v43 }
 0x2a0   :  { %4020 = vmatprep.subr.bf16.mxu0 %v4925_v14  ;;  %4051 = vmatprep.subr.bf16.mxu1 %v5674_v37 }
 0x2a2   :  { %1224 = vmatmul.mubr.f32.vlgmr.msra.gmra.mrb[6].mxu0 %v1157_v7  ;;  %3310 = vmatmul.mubr.f32.vlgmr.msra.gmra.mrb[12].mxu1 %v1157_v7 }
 0x2a3   :  { %4022 = vmatpush1.bf16.msra.mxu0 %v4929_v25  ;;  %4053 = vmatpush3.bf16.msra.mxu1 %v4963_v58 }
 0x2a4   :  { %4024 = vmatprep.subr.bf16.mxu0 %v4940_v29  ;;  %4054 = vmatprep.subr.bf16.mxu1 %v5674_v37 }
 0x2a5   :  { %1364 = vmatprep.mubr.f32.mxu0 %v5675_v5  ;;  %3344 = vmatprep.mubr.msk.f32.mxu1 %vm4768_vm0, %v5675_v5 }
 0x2a7   :  { %4026 = vmatpush1.bf16.msra.mxu0 %v4947_v40  ;;  %4056 = vmatpush3.bf16.msra.mxu1 %v4975_v18 }
 0x2a8   :  { %4028 = vmatprep.subr.bf16.mxu0 %v4954_v47  ;;  %4057 = vmatprep.subr.bf16.mxu1 %v5674_v37 }
 0x2ab   :  { %4030 = vmatpush1.bf16.msra.mxu0 %v4960_v56  ;;  %4059 = vmatpush3.bf16.msra.mxu1 %v4988_v38 }
 0x2ac   :  { %4032 = vmatprep.subr.bf16.mxu0 %v4967_v61  ;;  %4060 = vmatprep.subr.bf16.mxu1 %v5674_v37 }
 0x2af   :  { %4034 = vmatpush1.bf16.msra.mxu0 %v4972_v12  ;;  %4062 = vmatpush3.bf16.msra.mxu1 %v4998_v57 }
 0x2b0   :  { %4036 = vmatprep.subr.bf16.mxu0 %v4979_v20  ;;  %4063 = vmatprep.subr.bf16.mxu1 %v5674_v37 }
 0x2b3   :  { %4038 = vmatpush1.bf16.msra.mxu0 %v4985_v36  ;;  %4065 = vmatpush3.bf16.msra.mxu1 %v5008_v21 }
 0x2b4   :  { %4040 = vmatprep.subr.bf16.mxu0 %v4991_v39  ;;  %4066 = vmatprep.subr.bf16.mxu1 %v5674_v37 }
 0x2b7   :  { %4042 = vmatpush1.bf16.msra.mxu0 %v4995_v52  ;;  %4068 = vmatpush3.bf16.msra.mxu1 %v5018_v41 }
 0x2b8   :  { %4044 = vmatprep.subr.bf16.mxu0 %v5684_v26  ;;  %4069 = vmatprep.subr.bf16.mxu1 %v5674_v37  ;;  %v978_v26 = vadd.f32 %v977_v59, %v5120_v55  ;;  %v1476_v59 = vld [vmem:[#allocation3 + $0x20] sm:$0xff] }
 0x2bb   :  { %4046 = vmatpush1.bf16.msra.mxu0 %v5685_v23  ;;  %4071 = vmatpush3.bf16.msra.mxu1 %v5686_v19 }
 0x2bc   :  { %4048 = vmatprep.subr.bf16.mxu0 %v5687_v31  ;;  %4072 = vmatprep.subr.bf16.mxu1 %v5674_v37 }
 0x2bf   :  { %4050 = vmatpush1.bf16.msra.mxu0 %v5688_v0  ;;  %4074 = vmatpush3.bf16.msra.mxu1 %v5689_v50 }
 0x2c0   :  { %4076 = vmatprep.subr.bf16.mxu0 %v5690_v6  ;;  %4107 = vmatprep.subr.bf16.mxu1 %v5674_v37 }
 0x355   :  { %v1047_v3 = vpop.f32.mrb[4].mxu0  ;;  %v1118_v1 = vpop.f32.mrb[10].mxu1 }
 0x356   :  { %v4532_v4 = vadd.f32 %v5112_v2, %v1047_v3  ;;  %v1049_v49 = vpop.f32.mrb[5].mxu0  ;;  %v3276_v15 = vpop.f32.mrb[11].mxu1  ;;  %v1119_v6 = vadd.f32 %v1118_v1, %v5118_v48  ;;  %v5695_v1 = vld [vmem:[#allocation17_spill] sm:$0xff] }
 0x357   :  { %v4534_v32 = vadd.f32 %v5683_v8, %v1049_v49 }
 0x358   :  { %v2775_v46 = vmul.f32 -1.442695, %v4532_v4 }
 0x359   :  { %v2776_v7 = vmul.f32 -1.442695, %v4534_v32 }
 0x35a   :  { %4605 = vpow2.f32 %v2775_v46  ;;  %v1149_v46 = vpop.permute.xlu1 %1148 }
 0x35b   :  { %4607 = vpow2.f32 %v2776_v7  ;;  %vm1150_vm11 = vcmp.eq.s32.totalorder %v1149_v46, 1 }
 0x364   :  { %v4606_v31 = vpop.eup %4605 }
 0x365   :  { %v1126_v0 = vadd.f32 1.0, %v4606_v31  ;;  %v4608_v50 = vpop.eup %4607 }
 0x366   :  { %v1133_v19 = vadd.f32 1.0, %v4608_v50 }
 0x367   :  { %4609 = vrcp.f32 %v1126_v0 }
 0x368   :  { %4611 = vrcp.f32 %v1133_v19  ;;  %v5693_v19 = vld [vmem:[#allocation16_spill] sm:$0xff] }
 0x371   :  { %v4610_v23 = vpop.eup %4609 }
 0x372   :  { %v1136_v41 = vmul.f32 %v4610_v23, %v1119_v6  ;;  %v4612_v4 = vpop.eup %4611  ;;  %v5692_v23 = vld [vmem:[#allocation15_spill] sm:$0xff]  ;;  %v5694_v6 = vld [vmem:[#allocation20_spill] sm:$0xff] }
 0x373   :  { %v1139_v15 = vsub.f32 1.0, %v4612_v4  ;;  %v1141_v7 = vmul.f32 %v4612_v4, %v5214_v28  ;;  %v5697_v4 = vld [vmem:[#allocation21_spill] sm:$0xff] }
 0x374   :  { %v1137_v3 = vadd.f32 %v1136_v41, %v978_v26  ;;  %v5691_v26 = vld [vmem:[#allocation19_spill] sm:$0xff] }
 0x375   :  { %v1296_v41 = vpop.f32.mrb[12].mxu1 }
 0x376   :  { %4613 = vtanh.f32 %v1137_v3  ;;  %v5696_v3 = vld [vmem:[#allocation18_spill] sm:$0xff] }
 0x380   :  { %v4614_v49 = vpop.eup %4613 }
 0x381   :  { %v1140_v32 = vmul.f32 %v4614_v49, %v1139_v15  ;;  %v5698_v15 = vld [vmem:[#allocation13_spill] sm:$0xff] }
 0x383   :  { %v1142_v31 = vadd.f32 %v1141_v7, %v1140_v32 }
 0x385   :  { %v5294_v0 = vsel %vm1150_vm11, %v1142_v31, %v5214_v28  ;;  %v1153_v50 = vsel %vm1150_vm11, %v1142_v31, 0.0  ;;  %v3311_v28 = vpop.f32.mrb[13].mxu1 }
 0x386   :  { %1155 = vst [vmem:[#allocation9 + $0x10] sm:$0xff] %v1153_v50  ;;  %1365 = vmatmul.mubr.f32.vlgmr.msra.gmra.mrb[6].mxu0 %v5294_v0  ;;  %3345 = vmatmul.mubr.f32.vlgmr.msra.gmra.mrb[14].mxu1 %v5294_v0 }
 0x387   :  { %4078 = vmatpush1.bf16.msra.mxu0 %v4859_v10  ;;  %4109 = vmatpush3.bf16.msra.mxu1 %v4876_v30 }
 0x388   :  { %4080 = vmatprep.subr.bf16.mxu0 %v4861_v11  ;;  %4110 = vmatprep.subr.bf16.mxu1 %v5674_v37 }
 0x389   :  { %1542 = vmatprep.mubr.f32.mxu0 %v5675_v5  ;;  %3379 = vmatprep.mubr.msk.f32.mxu1 %vm4768_vm0, %v5675_v5 }
 0x38b   :  { %4082 = vmatpush1.bf16.msra.mxu0 %v4865_v16  ;;  %4112 = vmatpush3.bf16.msra.mxu1 %v4882_v34 }
 0x38c   :  { %4084 = vmatprep.subr.bf16.mxu0 %v4868_v17  ;;  %4113 = vmatprep.subr.bf16.mxu1 %v5674_v37 }
 0x38f   :  { %4086 = vmatpush1.bf16.msra.mxu0 %v4871_v22  ;;  %4115 = vmatpush3.bf16.msra.mxu1 %v4892_v44 }
 0x390   :  { %4088 = vmatprep.subr.bf16.mxu0 %v4874_v24  ;;  %4116 = vmatprep.subr.bf16.mxu1 %v5674_v37 }
 0x393   :  { %4090 = vmatpush1.bf16.msra.mxu0 %v4879_v33  ;;  %4118 = vmatpush3.bf16.msra.mxu1 %v4902_v53 }
 0x394   :  { %4092 = vmatprep.subr.bf16.mxu0 %v4885_v35  ;;  %4119 = vmatprep.subr.bf16.mxu1 %v5674_v37 }
 0x397   :  { %4094 = vmatpush1.bf16.msra.mxu0 %v4889_v42  ;;  %4121 = vmatpush3.bf16.msra.mxu1 %v4912_v62 }
 0x398   :  { %4096 = vmatprep.subr.bf16.mxu0 %v4895_v45  ;;  %4122 = vmatprep.subr.bf16.mxu1 %v5674_v37 }
 0x39b   :  { %4098 = vmatpush1.bf16.msra.mxu0 %v4899_v51  ;;  %4124 = vmatpush3.bf16.msra.mxu1 %v4922_v13 }
 0x39c   :  { %4100 = vmatprep.subr.bf16.mxu0 %v4905_v54  ;;  %4125 = vmatprep.subr.bf16.mxu1 %v5674_v37 }
 0x39f   :  { %4102 = vmatpush1.bf16.msra.mxu0 %v4909_v60  ;;  %4127 = vmatpush3.bf16.msra.mxu1 %v4932_v27 }
 0x3a0   :  { %4104 = vmatprep.subr.bf16.mxu0 %v4915_v63  ;;  %4128 = vmatprep.subr.bf16.mxu1 %v5674_v37 }
 0x3a3   :  { %4106 = vmatpush1.bf16.msra.mxu0 %v4919_v9  ;;  %4130 = vmatpush3.bf16.msra.mxu1 %v4950_v43 }
 0x3a4   :  { %4132 = vmatprep.subr.bf16.mxu0 %v4925_v14  ;;  %4163 = vmatprep.subr.bf16.mxu1 %v5674_v37 }
 0x3a6   :  { %1543 = vmatmul.mubr.f32.vlgmr.msra.gmra.mrb[8].mxu0 %v1476_v59  ;;  %3380 = vmatmul.mubr.f32.vlgmr.msra.gmra.mrb[16].mxu1 %v1476_v59 }
 0x3a7   :  { %4134 = vmatpush1.bf16.msra.mxu0 %v4929_v25  ;;  %4165 = vmatpush3.bf16.msra.mxu1 %v4963_v58 }
 0x3a8   :  { %4136 = vmatprep.subr.bf16.mxu0 %v4940_v29  ;;  %4166 = vmatprep.subr.bf16.mxu1 %v5674_v37 }
 0x3a9   :  { %1683 = vmatprep.mubr.f32.mxu0 %v5675_v5  ;;  %3414 = vmatprep.mubr.msk.f32.mxu1 %vm4768_vm0, %v5675_v5 }
 0x3ab   :  { %4138 = vmatpush1.bf16.msra.mxu0 %v4947_v40  ;;  %4168 = vmatpush3.bf16.msra.mxu1 %v4975_v18 }
 0x3ac   :  { %4140 = vmatprep.subr.bf16.mxu0 %v4954_v47  ;;  %4169 = vmatprep.subr.bf16.mxu1 %v5674_v37 }
 0x3af   :  { %4142 = vmatpush1.bf16.msra.mxu0 %v4960_v56  ;;  %4171 = vmatpush3.bf16.msra.mxu1 %v4988_v38 }
 0x3b0   :  { %4144 = vmatprep.subr.bf16.mxu0 %v4967_v61  ;;  %4172 = vmatprep.subr.bf16.mxu1 %v5674_v37 }
 0x3b3   :  { %4146 = vmatpush1.bf16.msra.mxu0 %v4972_v12  ;;  %4174 = vmatpush3.bf16.msra.mxu1 %v4998_v57 }
 0x3b4   :  { %4148 = vmatprep.subr.bf16.mxu0 %v4979_v20  ;;  %4175 = vmatprep.subr.bf16.mxu1 %v5674_v37 }
 0x3b7   :  { %4150 = vmatpush1.bf16.msra.mxu0 %v4985_v36  ;;  %4177 = vmatpush3.bf16.msra.mxu1 %v5008_v21 }
 0x3b8   :  { %4152 = vmatprep.subr.bf16.mxu0 %v4991_v39  ;;  %4178 = vmatprep.subr.bf16.mxu1 %v5674_v37 }
 0x3bb   :  { %4154 = vmatpush1.bf16.msra.mxu0 %v4995_v52  ;;  %4180 = vmatpush3.bf16.msra.mxu1 %v5691_v26 }
 0x3bc   :  { %4156 = vmatprep.subr.bf16.mxu0 %v5692_v23  ;;  %4181 = vmatprep.subr.bf16.mxu1 %v5674_v37  ;;  %v1297_v23 = vadd.f32 %v1296_v41, %v5120_v55 }
 0x3bf   :  { %4158 = vmatpush1.bf16.msra.mxu0 %v5693_v19  ;;  %4183 = vmatpush3.bf16.msra.mxu1 %v5694_v6 }
 0x3c0   :  { %4160 = vmatprep.subr.bf16.mxu0 %v5695_v1  ;;  %4184 = vmatprep.subr.bf16.mxu1 %v5674_v37 }
 0x3c3   :  { %4162 = vmatpush1.bf16.msra.mxu0 %v5696_v3  ;;  %4186 = vmatpush3.bf16.msra.mxu1 %v5697_v4 }
 0x3c4   :  { %4188 = vmatprep.subr.bf16.mxu0 %v5698_v15  ;;  %4219 = vmatprep.subr.bf16.mxu1 %v5674_v37 }
 0x459   :  { %v1366_v49 = vpop.f32.mrb[6].mxu0  ;;  %v1437_v46 = vpop.f32.mrb[14].mxu1 }
 0x45a   :  { %v4536_v32 = vadd.f32 %v5112_v2, %v1366_v49  ;;  %v1368_v7 = vpop.f32.mrb[7].mxu0  ;;  %v3346_v31 = vpop.f32.mrb[15].mxu1  ;;  %v1438_v15 = vadd.f32 %v1437_v46, %v5118_v48  ;;  %v5703_v46 = vld [vmem:[#allocation17_spill] sm:$0xff] }
 0x45b   :  { %v4538_v28 = vadd.f32 %v5683_v8, %v1368_v7 }
 0x45c   :  { %v2778_v50 = vmul.f32 -1.442695, %v4536_v32 }
 0x45d   :  { %v2779_v59 = vmul.f32 -1.442695, %v4538_v28 }
 0x45e   :  { %4615 = vpow2.f32 %v2778_v50 }
 0x45f   :  { %4617 = vpow2.f32 %v2779_v59  ;;  %v1468_v59 = vpop.permute.xlu1 %1467 }
 0x460   :  { %vm1469_vm12 = vcmp.eq.s32.totalorder %v1468_v59, 1 }
 0x468   :  { %v4616_v1 = vpop.eup %4615 }
 0x469   :  { %v1445_v3 = vadd.f32 1.0, %v4616_v1  ;;  %v4618_v4 = vpop.eup %4617 }
 0x46a   :  { %v1452_v6 = vadd.f32 1.0, %v4618_v4 }
 0x46b   :  { %4619 = vrcp.f32 %v1445_v3 }
 0x46c   :  { %4621 = vrcp.f32 %v1452_v6  ;;  %v5701_v6 = vld [vmem:[#allocation16_spill] sm:$0xff] }
 0x475   :  { %v4620_v19 = vpop.eup %4619 }
 0x476   :  { %v1455_v26 = vmul.f32 %v4620_v19, %v1438_v15  ;;  %v4622_v32 = vpop.eup %4621  ;;  %v5700_v19 = vld [vmem:[#allocation15_spill] sm:$0xff]  ;;  %v5702_v15 = vld [vmem:[#allocation20_spill] sm:$0xff] }
 0x477   :  { %v1458_v31 = vsub.f32 1.0, %v4622_v32  ;;  %v1460_v28 = vmul.f32 %v4622_v32, %v5294_v0  ;;  %v5705_v32 = vld [vmem:[#allocation21_spill] sm:$0xff] }
 0x478   :  { %v1456_v49 = vadd.f32 %v1455_v26, %v1297_v23  ;;  %v1795_v26 = vld [vmem:[#allocation3 + $0x28] sm:$0xff]  ;;  %v5699_v23 = vld [vmem:[#allocation19_spill] sm:$0xff] }
 0x47a   :  { %4623 = vtanh.f32 %v1456_v49  ;;  %v5704_v49 = vld [vmem:[#allocation18_spill] sm:$0xff] }
 0x484   :  { %v4624_v7 = vpop.eup %4623 }
 0x485   :  { %v1459_v50 = vmul.f32 %v4624_v7, %v1458_v31  ;;  %v5706_v31 = vld [vmem:[#allocation13_spill] sm:$0xff] }
 0x487   :  { %v1461_v1 = vadd.f32 %v1460_v28, %v1459_v50 }
 0x489   :  { %v5374_v3 = vsel %vm1469_vm12, %v1461_v1, %v5294_v0  ;;  %v1472_v4 = vsel %vm1469_vm12, %v1461_v1, 0.0  ;;  %v1615_v0 = vpop.f32.mrb[16].mxu1 }
 0x48a   :  { %1474 = vst [vmem:[#allocation9 + $0x18] sm:$0xff] %v1472_v4  ;;  %1684 = vmatmul.mubr.f32.vlgmr.msra.gmra.mrb[8].mxu0 %v5374_v3  ;;  %3415 = vmatmul.mubr.f32.vlgmr.msra.gmra.mrb[18].mxu1 %v5374_v3  ;;  %v3381_v41 = vpop.f32.mrb[17].mxu1 }
 0x48b   :  { %4190 = vmatpush1.bf16.msra.mxu0 %v4859_v10  ;;  %4221 = vmatpush3.bf16.msra.mxu1 %v4876_v30 }
 0x48c   :  { %4192 = vmatprep.subr.bf16.mxu0 %v4861_v11  ;;  %4222 = vmatprep.subr.bf16.mxu1 %v5674_v37 }
 0x48d   :  { %1861 = vmatprep.mubr.f32.mxu0 %v5675_v5  ;;  %3449 = vmatprep.mubr.msk.f32.mxu1 %vm4768_vm0, %v5675_v5 }
 0x48f   :  { %4194 = vmatpush1.bf16.msra.mxu0 %v4865_v16  ;;  %4224 = vmatpush3.bf16.msra.mxu1 %v4882_v34 }
 0x490   :  { %4196 = vmatprep.subr.bf16.mxu0 %v4868_v17  ;;  %4225 = vmatprep.subr.bf16.mxu1 %v5674_v37 }
 0x493   :  { %4198 = vmatpush1.bf16.msra.mxu0 %v4871_v22  ;;  %4227 = vmatpush3.bf16.msra.mxu1 %v4892_v44 }
 0x494   :  { %4200 = vmatprep.subr.bf16.mxu0 %v4874_v24  ;;  %4228 = vmatprep.subr.bf16.mxu1 %v5674_v37 }
 0x497   :  { %4202 = vmatpush1.bf16.msra.mxu0 %v4879_v33  ;;  %4230 = vmatpush3.bf16.msra.mxu1 %v4902_v53 }
 0x498   :  { %4204 = vmatprep.subr.bf16.mxu0 %v4885_v35  ;;  %4231 = vmatprep.subr.bf16.mxu1 %v5674_v37 }
 0x49b   :  { %4206 = vmatpush1.bf16.msra.mxu0 %v4889_v42  ;;  %4233 = vmatpush3.bf16.msra.mxu1 %v4912_v62 }
 0x49c   :  { %4208 = vmatprep.subr.bf16.mxu0 %v4895_v45  ;;  %4234 = vmatprep.subr.bf16.mxu1 %v5674_v37 }
 0x49f   :  { %4210 = vmatpush1.bf16.msra.mxu0 %v4899_v51  ;;  %4236 = vmatpush3.bf16.msra.mxu1 %v4922_v13 }
 0x4a0   :  { %4212 = vmatprep.subr.bf16.mxu0 %v4905_v54  ;;  %4237 = vmatprep.subr.bf16.mxu1 %v5674_v37 }
 0x4a3   :  { %4214 = vmatpush1.bf16.msra.mxu0 %v4909_v60  ;;  %4239 = vmatpush3.bf16.msra.mxu1 %v4932_v27 }
 0x4a4   :  { %4216 = vmatprep.subr.bf16.mxu0 %v4915_v63  ;;  %4240 = vmatprep.subr.bf16.mxu1 %v5674_v37 }
 0x4a7   :  { %4218 = vmatpush1.bf16.msra.mxu0 %v4919_v9  ;;  %4242 = vmatpush3.bf16.msra.mxu1 %v4950_v43 }
 0x4a8   :  { %4244 = vmatprep.subr.bf16.mxu0 %v4925_v14  ;;  %4275 = vmatprep.subr.bf16.mxu1 %v5674_v37 }
 0x4aa   :  { %1862 = vmatmul.mubr.f32.vlgmr.msra.gmra.mrb[10].mxu0 %v1795_v26  ;;  %3450 = vmatmul.mubr.f32.vlgmr.msra.gmra.mrb[20].mxu1 %v1795_v26 }
 0x4ab   :  { %4246 = vmatpush1.bf16.msra.mxu0 %v4929_v25  ;;  %4277 = vmatpush3.bf16.msra.mxu1 %v4963_v58 }
 0x4ac   :  { %4248 = vmatprep.subr.bf16.mxu0 %v4940_v29  ;;  %4278 = vmatprep.subr.bf16.mxu1 %v5674_v37 }
 0x4ad   :  { %2002 = vmatprep.mubr.f32.mxu0 %v5675_v5  ;;  %3484 = vmatprep.mubr.msk.f32.mxu1 %vm4768_vm0, %v5675_v5 }
 0x4af   :  { %4250 = vmatpush1.bf16.msra.mxu0 %v4947_v40  ;;  %4280 = vmatpush3.bf16.msra.mxu1 %v4975_v18 }
 0x4b0   :  { %4252 = vmatprep.subr.bf16.mxu0 %v4954_v47  ;;  %4281 = vmatprep.subr.bf16.mxu1 %v5674_v37 }
 0x4b3   :  { %4254 = vmatpush1.bf16.msra.mxu0 %v4960_v56  ;;  %4283 = vmatpush3.bf16.msra.mxu1 %v4988_v38 }
 0x4b4   :  { %4256 = vmatprep.subr.bf16.mxu0 %v4967_v61  ;;  %4284 = vmatprep.subr.bf16.mxu1 %v5674_v37 }
 0x4b7   :  { %4258 = vmatpush1.bf16.msra.mxu0 %v4972_v12  ;;  %4286 = vmatpush3.bf16.msra.mxu1 %v4998_v57 }
 0x4b8   :  { %4260 = vmatprep.subr.bf16.mxu0 %v4979_v20  ;;  %4287 = vmatprep.subr.bf16.mxu1 %v5674_v37 }
 0x4bb   :  { %4262 = vmatpush1.bf16.msra.mxu0 %v4985_v36  ;;  %4289 = vmatpush3.bf16.msra.mxu1 %v5008_v21 }
 0x4bc   :  { %4264 = vmatprep.subr.bf16.mxu0 %v4991_v39  ;;  %4290 = vmatprep.subr.bf16.mxu1 %v5674_v37 }
 0x4bf   :  { %4266 = vmatpush1.bf16.msra.mxu0 %v4995_v52  ;;  %4292 = vmatpush3.bf16.msra.mxu1 %v5699_v23 }
 0x4c0   :  { %4268 = vmatprep.subr.bf16.mxu0 %v5700_v19  ;;  %4293 = vmatprep.subr.bf16.mxu1 %v5674_v37  ;;  %v1616_v19 = vadd.f32 %v1615_v0, %v5120_v55 }
 0x4c3   :  { %4270 = vmatpush1.bf16.msra.mxu0 %v5701_v6  ;;  %4295 = vmatpush3.bf16.msra.mxu1 %v5702_v15 }
 0x4c4   :  { %4272 = vmatprep.subr.bf16.mxu0 %v5703_v46  ;;  %4296 = vmatprep.subr.bf16.mxu1 %v5674_v37 }
 0x4c7   :  { %4274 = vmatpush1.bf16.msra.mxu0 %v5704_v49  ;;  %4298 = vmatpush3.bf16.msra.mxu1 %v5705_v32 }
 0x4c8   :  { %4300 = vmatprep.subr.bf16.mxu0 %v5706_v31  ;;  %4331 = vmatprep.subr.bf16.mxu1 %v5674_v37 }
 0x55d   :  { %v1685_v7 = vpop.f32.mrb[8].mxu0  ;;  %v1756_v50 = vpop.f32.mrb[18].mxu1 }
 0x55e   :  { %v4540_v28 = vadd.f32 %v5112_v2, %v1685_v7  ;;  %v1687_v59 = vpop.f32.mrb[9].mxu0  ;;  %v3416_v1 = vpop.f32.mrb[19].mxu1  ;;  %v1757_v31 = vadd.f32 %v1756_v50, %v5118_v48  ;;  %v5711_v50 = vld [vmem:[#allocation17_spill] sm:$0xff] }
 0x55f   :  { %v4542_v41 = vadd.f32 %v5683_v8, %v1687_v59 }
 0x560   :  { %v2781_v4 = vmul.f32 -1.442695, %v4540_v28 }
 0x561   :  { %v2782_v26 = vmul.f32 -1.442695, %v4542_v41 }
 0x562   :  { %4625 = vpow2.f32 %v2781_v4 }
 0x563   :  { %4627 = vpow2.f32 %v2782_v26  ;;  %v1787_v26 = vpop.permute.xlu0 %1786 }
 0x564   :  { %vm1788_vm13 = vcmp.eq.s32.totalorder %v1787_v26, 1 }
 0x56c   :  { %v4626_v46 = vpop.eup %4625 }
 0x56d   :  { %v1764_v49 = vadd.f32 1.0, %v4626_v46  ;;  %v4628_v32 = vpop.eup %4627 }
 0x56e   :  { %v1771_v15 = vadd.f32 1.0, %v4628_v32 }
 0x56f   :  { %4629 = vrcp.f32 %v1764_v49 }
 0x570   :  { %4631 = vrcp.f32 %v1771_v15  ;;  %v5709_v15 = vld [vmem:[#allocation16_spill] sm:$0xff] }
 0x579   :  { %v4630_v6 = vpop.eup %4629 }
 0x57a   :  { %v1774_v23 = vmul.f32 %v4630_v6, %v1757_v31  ;;  %v4632_v28 = vpop.eup %4631  ;;  %v5708_v6 = vld [vmem:[#allocation15_spill] sm:$0xff]  ;;  %v5710_v31 = vld [vmem:[#allocation20_spill] sm:$0xff] }
 0x57b   :  { %v1777_v1 = vsub.f32 1.0, %v4632_v28  ;;  %v1779_v41 = vmul.f32 %v4632_v28, %v5374_v3  ;;  %v5713_v28 = vld [vmem:[#allocation21_spill] sm:$0xff] }
 0x57c   :  { %v1775_v7 = vadd.f32 %v1774_v23, %v1616_v19  ;;  %v2114_v23 = vld [vmem:[#allocation3 + $0x30] sm:$0xff] }
 0x57d   :  { %v5707_v19 = vld [vmem:[#allocation19_spill] sm:$0xff] }
 0x57e   :  { %4633 = vtanh.f32 %v1775_v7  ;;  %v5712_v7 = vld [vmem:[#allocation18_spill] sm:$0xff] }
 0x588   :  { %v4634_v59 = vpop.eup %4633 }
 0x589   :  { %v1778_v4 = vmul.f32 %v4634_v59, %v1777_v1  ;;  %v5714_v1 = vld [vmem:[#allocation13_spill] sm:$0xff] }
 0x58b   :  { %v1780_v46 = vadd.f32 %v1779_v41, %v1778_v4 }
 0x58d   :  { %v5454_v49 = vsel %vm1788_vm13, %v1780_v46, %v5374_v3  ;;  %v1791_v32 = vsel %vm1788_vm13, %v1780_v46, 0.0  ;;  %v1934_v3 = vpop.f32.mrb[20].mxu1 }
 0x58e   :  { %1793 = vst [vmem:[#allocation9 + $0x20] sm:$0xff] %v1791_v32  ;;  %2003 = vmatmul.mubr.f32.vlgmr.msra.gmra.mrb[10].mxu0 %v5454_v49  ;;  %3485 = vmatmul.mubr.f32.vlgmr.msra.gmra.mrb[22].mxu1 %v5454_v49  ;;  %v3451_v0 = vpop.f32.mrb[21].mxu1 }
 0x58f   :  { %4302 = vmatpush1.bf16.msra.mxu0 %v4859_v10  ;;  %4333 = vmatpush3.bf16.msra.mxu1 %v4876_v30 }
 0x590   :  { %4304 = vmatprep.subr.bf16.mxu0 %v4861_v11  ;;  %4334 = vmatprep.subr.bf16.mxu1 %v5674_v37 }
 0x591   :  { %2180 = vmatprep.mubr.f32.mxu0 %v5675_v5  ;;  %3519 = vmatprep.mubr.msk.f32.mxu1 %vm4768_vm0, %v5675_v5 }
 0x593   :  { %4306 = vmatpush1.bf16.msra.mxu0 %v4865_v16  ;;  %4336 = vmatpush3.bf16.msra.mxu1 %v4882_v34 }
 0x594   :  { %4308 = vmatprep.subr.bf16.mxu0 %v4868_v17  ;;  %4337 = vmatprep.subr.bf16.mxu1 %v5674_v37 }
 0x597   :  { %4310 = vmatpush1.bf16.msra.mxu0 %v4871_v22  ;;  %4339 = vmatpush3.bf16.msra.mxu1 %v4892_v44 }
 0x598   :  { %4312 = vmatprep.subr.bf16.mxu0 %v4874_v24  ;;  %4340 = vmatprep.subr.bf16.mxu1 %v5674_v37 }
 0x59b   :  { %4314 = vmatpush1.bf16.msra.mxu0 %v4879_v33  ;;  %4342 = vmatpush3.bf16.msra.mxu1 %v4902_v53 }
 0x59c   :  { %4316 = vmatprep.subr.bf16.mxu0 %v4885_v35  ;;  %4343 = vmatprep.subr.bf16.mxu1 %v5674_v37 }
 0x59f   :  { %4318 = vmatpush1.bf16.msra.mxu0 %v4889_v42  ;;  %4345 = vmatpush3.bf16.msra.mxu1 %v4912_v62 }
 0x5a0   :  { %4320 = vmatprep.subr.bf16.mxu0 %v4895_v45  ;;  %4346 = vmatprep.subr.bf16.mxu1 %v5674_v37 }
 0x5a3   :  { %4322 = vmatpush1.bf16.msra.mxu0 %v4899_v51  ;;  %4348 = vmatpush3.bf16.msra.mxu1 %v4922_v13 }
 0x5a4   :  { %4324 = vmatprep.subr.bf16.mxu0 %v4905_v54  ;;  %4349 = vmatprep.subr.bf16.mxu1 %v5674_v37 }
 0x5a7   :  { %4326 = vmatpush1.bf16.msra.mxu0 %v4909_v60  ;;  %4351 = vmatpush3.bf16.msra.mxu1 %v4932_v27 }
 0x5a8   :  { %4328 = vmatprep.subr.bf16.mxu0 %v4915_v63  ;;  %4352 = vmatprep.subr.bf16.mxu1 %v5674_v37 }
 0x5ab   :  { %4330 = vmatpush1.bf16.msra.mxu0 %v4919_v9  ;;  %4354 = vmatpush3.bf16.msra.mxu1 %v4950_v43 }
 0x5ac   :  { %4356 = vmatprep.subr.bf16.mxu0 %v4925_v14  ;;  %4387 = vmatprep.subr.bf16.mxu1 %v5674_v37 }
 0x5ae   :  { %2181 = vmatmul.mubr.f32.vlgmr.msra.gmra.mrb[12].mxu0 %v2114_v23  ;;  %3520 = vmatmul.mubr.f32.vlgmr.msra.gmra.mrb[24].mxu1 %v2114_v23 }
 0x5af   :  { %4358 = vmatpush1.bf16.msra.mxu0 %v4929_v25  ;;  %4389 = vmatpush3.bf16.msra.mxu1 %v4963_v58 }
 0x5b0   :  { %4360 = vmatprep.subr.bf16.mxu0 %v4940_v29  ;;  %4390 = vmatprep.subr.bf16.mxu1 %v5674_v37 }
 0x5b1   :  { %2321 = vmatprep.mubr.f32.mxu0 %v5675_v5  ;;  %3554 = vmatprep.mubr.msk.f32.mxu1 %vm4768_vm0, %v5675_v5 }
 0x5b3   :  { %4362 = vmatpush1.bf16.msra.mxu0 %v4947_v40  ;;  %4392 = vmatpush3.bf16.msra.mxu1 %v4975_v18 }
 0x5b4   :  { %4364 = vmatprep.subr.bf16.mxu0 %v4954_v47  ;;  %4393 = vmatprep.subr.bf16.mxu1 %v5674_v37 }
 0x5b7   :  { %4366 = vmatpush1.bf16.msra.mxu0 %v4960_v56  ;;  %4395 = vmatpush3.bf16.msra.mxu1 %v4988_v38 }
 0x5b8   :  { %4368 = vmatprep.subr.bf16.mxu0 %v4967_v61  ;;  %4396 = vmatprep.subr.bf16.mxu1 %v5674_v37 }
 0x5bb   :  { %4370 = vmatpush1.bf16.msra.mxu0 %v4972_v12  ;;  %4398 = vmatpush3.bf16.msra.mxu1 %v4998_v57 }
 0x5bc   :  { %4372 = vmatprep.subr.bf16.mxu0 %v4979_v20  ;;  %4399 = vmatprep.subr.bf16.mxu1 %v5674_v37 }
 0x5bf   :  { %4374 = vmatpush1.bf16.msra.mxu0 %v4985_v36  ;;  %4401 = vmatpush3.bf16.msra.mxu1 %v5008_v21 }
 0x5c0   :  { %4376 = vmatprep.subr.bf16.mxu0 %v4991_v39  ;;  %4402 = vmatprep.subr.bf16.mxu1 %v5674_v37 }
 0x5c3   :  { %4378 = vmatpush1.bf16.msra.mxu0 %v4995_v52  ;;  %4404 = vmatpush3.bf16.msra.mxu1 %v5707_v19 }
 0x5c4   :  { %4380 = vmatprep.subr.bf16.mxu0 %v5708_v6  ;;  %4405 = vmatprep.subr.bf16.mxu1 %v5674_v37  ;;  %v1935_v6 = vadd.f32 %v1934_v3, %v5120_v55 }
 0x5c7   :  { %4382 = vmatpush1.bf16.msra.mxu0 %v5709_v15  ;;  %4407 = vmatpush3.bf16.msra.mxu1 %v5710_v31 }
 0x5c8   :  { %4384 = vmatprep.subr.bf16.mxu0 %v5711_v50  ;;  %4408 = vmatprep.subr.bf16.mxu1 %v5674_v37 }
 0x5cb   :  { %4386 = vmatpush1.bf16.msra.mxu0 %v5712_v7  ;;  %4410 = vmatpush3.bf16.msra.mxu1 %v5713_v28 }
 0x5cc   :  { %4412 = vmatprep.subr.bf16.mxu0 %v5714_v1  ;;  %4443 = vmatprep.subr.bf16.mxu1 %v5674_v37 }
 0x661   :  { %v2004_v59 = vpop.f32.mrb[10].mxu0  ;;  %v2075_v4 = vpop.f32.mrb[22].mxu1 }
 0x662   :  { %v4544_v41 = vadd.f32 %v5112_v2, %v2004_v59  ;;  %v2006_v26 = vpop.f32.mrb[11].mxu0  ;;  %v3486_v46 = vpop.f32.mrb[23].mxu1  ;;  %v2076_v1 = vadd.f32 %v2075_v4, %v5118_v48 }
 0x663   :  { %v4546_v0 = vadd.f32 %v5683_v8, %v2006_v26 }
 0x664   :  { %v2784_v32 = vmul.f32 -1.442695, %v4544_v41 }
 0x665   :  { %v2785_v23 = vmul.f32 -1.442695, %v4546_v0 }
 0x666   :  { %4635 = vpow2.f32 %v2784_v32 }
 0x667   :  { %4637 = vpow2.f32 %v2785_v23  ;;  %v2106_v23 = vpop.permute.xlu1 %2105 }
 0x668   :  { %vm2107_vm14 = vcmp.eq.s32.totalorder %v2106_v23, 1 }
 0x66b   :  { %v2744_v23 = vpop.permute.xlu1 %2743 }
 0x670   :  { %v4636_v50 = vpop.eup %4635 }
 0x671   :  { %v2083_v7 = vadd.f32 1.0, %v4636_v50  ;;  %v4638_v28 = vpop.eup %4637 }
 0x672   :  { %v2090_v31 = vadd.f32 1.0, %v4638_v28 }
 0x673   :  { %4639 = vrcp.f32 %v2083_v7 }
 0x674   :  { %4641 = vrcp.f32 %v2090_v31 }
 0x67d   :  { %v4640_v15 = vpop.eup %4639 }
 0x67e   :  { %v2093_v19 = vmul.f32 %v4640_v15, %v2076_v1  ;;  %v4642_v41 = vpop.eup %4641 }
 0x67f   :  { %v2096_v46 = vsub.f32 1.0, %v4642_v41  ;;  %v2098_v0 = vmul.f32 %v4642_v41, %v5454_v49 }
 0x680   :  { %v2094_v59 = vadd.f32 %v2093_v19, %v1935_v6 }
 0x682   :  { %4643 = vtanh.f32 %v2094_v59 }
 0x68c   :  { %v4644_v26 = vpop.eup %4643 }
 0x68d   :  { %v2097_v32 = vmul.f32 %v4644_v26, %v2096_v46 }
 0x68f   :  { %v2099_v50 = vadd.f32 %v2098_v0, %v2097_v32 }
 0x691   :  { %v5534_v7 = vsel %vm2107_vm14, %v2099_v50, %v5454_v49  ;;  %v2110_v28 = vsel %vm2107_vm14, %v2099_v50, 0.0 }
 0x692   :  { %2112 = vst [vmem:[#allocation9 + $0x28] sm:$0xff] %v2110_v28  ;;  %2322 = vmatmul.mubr.f32.vlgmr.msra.gmra.mrb[12].mxu0 %v5534_v7  ;;  %3555 = vmatmul.mubr.f32.vlgmr.msra.gmra.mrb[26].mxu1 %v5534_v7 }
 0x693   :  { %4414 = vmatpush1.bf16.msra.mxu0 %v4859_v10  ;;  %4445 = vmatpush3.bf16.msra.mxu1 %v4876_v30  ;;  %v2253_v10 = vpop.f32.mrb[24].mxu1  ;;  %v5718_v30 = vld [vmem:[#allocation20_spill] sm:$0xff] }
 0x694   :  { %4416 = vmatprep.subr.bf16.mxu0 %v4861_v11  ;;  %4446 = vmatprep.subr.bf16.mxu1 %v5674_v37  ;;  %v3521_v11 = vpop.f32.mrb[25].mxu1 }
 0x695   :  { %2499 = vmatprep.mubr.f32.mxu0 %v5675_v5  ;;  %3589 = vmatprep.mubr.msk.f32.mxu1 %vm4768_vm0, %v5675_v5 }
 0x697   :  { %4418 = vmatpush1.bf16.msra.mxu0 %v4865_v16  ;;  %4448 = vmatpush3.bf16.msra.mxu1 %v4882_v34  ;;  %v2433_v16 = vld [vmem:[#allocation3 + $0x38] sm:$0xff]  ;;  %v5720_v34 = vld [vmem:[#allocation18_spill] sm:$0xff] }
 0x698   :  { %4420 = vmatprep.subr.bf16.mxu0 %v4868_v17  ;;  %4449 = vmatprep.subr.bf16.mxu1 %v5674_v37  ;;  %v5715_v17 = vld [vmem:[#allocation19_spill] sm:$0xff] }
 0x69b   :  { %4422 = vmatpush1.bf16.msra.mxu0 %v4871_v22  ;;  %4451 = vmatpush3.bf16.msra.mxu1 %v4892_v44  ;;  %v5716_v22 = vld [vmem:[#allocation15_spill] sm:$0xff] }
 0x69c   :  { %4424 = vmatprep.subr.bf16.mxu0 %v4874_v24  ;;  %4452 = vmatprep.subr.bf16.mxu1 %v5674_v37  ;;  %v5717_v24 = vld [vmem:[#allocation16_spill] sm:$0xff] }
 0x69f   :  { %4426 = vmatpush1.bf16.msra.mxu0 %v4879_v33  ;;  %4454 = vmatpush3.bf16.msra.mxu1 %v4902_v53  ;;  %v5719_v33 = vld [vmem:[#allocation17_spill] sm:$0xff] }
 0x6a0   :  { %4428 = vmatprep.subr.bf16.mxu0 %v4885_v35  ;;  %4455 = vmatprep.subr.bf16.mxu1 %v5674_v37  ;;  %v5721_v35 = vld [vmem:[#allocation21_spill] sm:$0xff] }
 0x6a3   :  { %4430 = vmatpush1.bf16.msra.mxu0 %v4889_v42  ;;  %4457 = vmatpush3.bf16.msra.mxu1 %v4912_v62 }
 0x6a4   :  { %4432 = vmatprep.subr.bf16.mxu0 %v4895_v45  ;;  %4458 = vmatprep.subr.bf16.mxu1 %v5674_v37 }
 0x6a7   :  { %4434 = vmatpush1.bf16.msra.mxu0 %v4899_v51  ;;  %4460 = vmatpush3.bf16.msra.mxu1 %v4922_v13 }
 0x6a8   :  { %4436 = vmatprep.subr.bf16.mxu0 %v4905_v54  ;;  %4461 = vmatprep.subr.bf16.mxu1 %v5674_v37 }
 0x6ab   :  { %4438 = vmatpush1.bf16.msra.mxu0 %v4909_v60  ;;  %4463 = vmatpush3.bf16.msra.mxu1 %v4932_v27 }
 0x6ac   :  { %4440 = vmatprep.subr.bf16.mxu0 %v4915_v63  ;;  %4464 = vmatprep.subr.bf16.mxu1 %v5674_v37 }
 0x6af   :  { %4442 = vmatpush1.bf16.msra.mxu0 %v4919_v9  ;;  %4466 = vmatpush3.bf16.msra.mxu1 %v4950_v43 }
 0x6b0   :  { %4468 = vmatprep.subr.bf16.mxu0 %v4925_v14  ;;  %4499 = vmatprep.subr.bf16.mxu1 %v5674_v37 }
 0x6b2   :  { %2500 = vmatmul.mubr.f32.vlgmr.msra.gmra.mrb[14].mxu0 %v2433_v16  ;;  %3590 = vmatmul.mubr.f32.vlgmr.msra.gmra.mrb[28].mxu1 %v2433_v16 }
 0x6b3   :  { %4470 = vmatpush1.bf16.msra.mxu0 %v4929_v25  ;;  %4501 = vmatpush3.bf16.msra.mxu1 %v4963_v58 }
 0x6b4   :  { %4472 = vmatprep.subr.bf16.mxu0 %v4940_v29  ;;  %4502 = vmatprep.subr.bf16.mxu1 %v5674_v37  ;;  %v2254_v29 = vadd.f32 %v2253_v10, %v5120_v55 }
 0x6b5   :  { %2640 = vmatprep.mubr.f32.mxu0 %v5675_v5  ;;  %3624 = vmatprep.mubr.msk.f32.mxu1 %vm4768_vm0, %v5675_v5  ;;  %vm2745_vm0 = vcmp.eq.s32.totalorder %v2744_v23, 1 }
 0x6b7   :  { %4474 = vmatpush1.bf16.msra.mxu0 %v4947_v40  ;;  %4504 = vmatpush3.bf16.msra.mxu1 %v4975_v18 }
 0x6b8   :  { %4476 = vmatprep.subr.bf16.mxu0 %v4954_v47  ;;  %4505 = vmatprep.subr.bf16.mxu1 %v5674_v37 }
 0x6bb   :  { %4478 = vmatpush1.bf16.msra.mxu0 %v4960_v56  ;;  %4507 = vmatpush3.bf16.msra.mxu1 %v4988_v38 }
 0x6bc   :  { %4480 = vmatprep.subr.bf16.mxu0 %v4967_v61  ;;  %4508 = vmatprep.subr.bf16.mxu1 %v5674_v37  ;;  %v2425_v61 = vpop.permute.xlu0 %2424 }
 0x6bd   :  { %vm2426_vm15 = vcmp.eq.s32.totalorder %v2425_v61, 1 }
 0x6bf   :  { %4482 = vmatpush1.bf16.msra.mxu0 %v4972_v12  ;;  %4510 = vmatpush3.bf16.msra.mxu1 %v4998_v57 }
 0x6c0   :  { %4484 = vmatprep.subr.bf16.mxu0 %v4979_v20  ;;  %4511 = vmatprep.subr.bf16.mxu1 %v5674_v37 }
 0x6c3   :  { %4486 = vmatpush1.bf16.msra.mxu0 %v4985_v36  ;;  %4513 = vmatpush3.bf16.msra.mxu1 %v5008_v21 }
 0x6c4   :  { %4488 = vmatprep.subr.bf16.mxu0 %v4991_v39  ;;  %4514 = vmatprep.subr.bf16.mxu1 %v5674_v37 }
 0x6c7   :  { %4490 = vmatpush1.bf16.msra.mxu0 %v4995_v52  ;;  %4516 = vmatpush3.bf16.msra.mxu1 %v5715_v17 }
 0x6c8   :  { %4492 = vmatprep.subr.bf16.mxu0 %v5716_v22  ;;  %4517 = vmatprep.subr.bf16.mxu1 %v5674_v37 }
 0x6cb   :  { %4494 = vmatpush1.bf16.msra.mxu0 %v5717_v24  ;;  %4519 = vmatpush3.bf16.msra.mxu1 %v5718_v30 }
 0x6cc   :  { %4496 = vmatprep.subr.bf16.mxu0 %v5719_v33  ;;  %4520 = vmatprep.subr.bf16.mxu1 %v5674_v37 }
 0x6cf   :  { %4498 = vmatpush1.bf16.msra.mxu0 %v5720_v34  ;;  %4522 = vmatpush3.bf16.msra.mxu1 %v5721_v35 }
 0x765   :  { %v2323_v42 = vpop.f32.mrb[12].mxu0  ;;  %v2394_v44 = vpop.f32.mrb[26].mxu1 }
 0x766   :  { %v4548_v45 = vadd.f32 %v5112_v2, %v2323_v42  ;;  %v2325_v51 = vpop.f32.mrb[13].mxu0  ;;  %v3556_v53 = vpop.f32.mrb[27].mxu1  ;;  %v2395_v25 = vadd.f32 %v2394_v44, %v5118_v48 }
 0x767   :  { %v4550_v60 = vadd.f32 %v5683_v8, %v2325_v51 }
 0x768   :  { %v2787_v54 = vmul.f32 -1.442695, %v4548_v45 }
 0x769   :  { %v2788_v62 = vmul.f32 -1.442695, %v4550_v60 }
 0x76a   :  { %4645 = vpow2.f32 %v2787_v54 }
 0x76b   :  { %4647 = vpow2.f32 %v2788_v62 }
 0x774   :  { %v4646_v63 = vpop.eup %4645 }
 0x775   :  { %v2402_v9 = vadd.f32 1.0, %v4646_v63  ;;  %v4648_v13 = vpop.eup %4647 }
 0x776   :  { %v2409_v14 = vadd.f32 1.0, %v4648_v13 }
 0x777   :  { %4649 = vrcp.f32 %v2402_v9 }
 0x778   :  { %4651 = vrcp.f32 %v2409_v14 }
 0x781   :  { %v4650_v27 = vpop.eup %4649 }
 0x782   :  { %v2412_v40 = vmul.f32 %v4650_v27, %v2395_v25  ;;  %v4652_v47 = vpop.eup %4651 }
 0x783   :  { %v2415_v56 = vsub.f32 1.0, %v4652_v47  ;;  %v2417_v18 = vmul.f32 %v4652_v47, %v5534_v7 }
 0x784   :  { %v2413_v43 = vadd.f32 %v2412_v40, %v2254_v29 }
 0x785   :  { %v2572_v39 = vpop.f32.mrb[28].mxu1 }
 0x786   :  { %4653 = vtanh.f32 %v2413_v43  ;;  %v3591_v52 = vpop.f32.mrb[29].mxu1  ;;  %v2573_v46 = vadd.f32 %v2572_v39, %v5120_v55 }
 0x790   :  { %v4654_v58 = vpop.eup %4653 }
 0x791   :  { %v2416_v12 = vmul.f32 %v4654_v58, %v2415_v56 }
 0x793   :  { %v2418_v20 = vadd.f32 %v2417_v18, %v2416_v12 }
 0x795   :  { %v2427_v36 = vsel %vm2426_vm15, %v2418_v20, %v5534_v7  ;;  %v2429_v38 = vsel %vm2426_vm15, %v2418_v20, 0.0 }
 0x796   :  { %2431 = vst [vmem:[#allocation9 + $0x30] sm:$0xff] %v2429_v38  ;;  %2641 = vmatmul.mubr.f32.vlgmr.msra.gmra.mrb[14].mxu0 %v2427_v36  ;;  %3625 = vmatmul.mubr.f32.vlgmr.msra.gmra.mrb[30].mxu1 %v2427_v36 }
 0x869   :  { %v2642_v57 = vpop.f32.mrb[14].mxu0  ;;  %v2713_v21 = vpop.f32.mrb[30].mxu1 }
 0x86a   :  { %v4552_v37 = vadd.f32 %v5112_v2, %v2642_v57  ;;  %v2644_v5 = vpop.f32.mrb[15].mxu0  ;;  %v3626_v49 = vpop.f32.mrb[31].mxu1  ;;  %v2714_v59 = vadd.f32 %v2713_v21, %v5118_v48 }
 0x86b   :  { %v4554_v19 = vadd.f32 %v5683_v8, %v2644_v5 }
 0x86c   :  { %v2790_v3 = vmul.f32 -1.442695, %v4552_v37 }
 0x86d   :  { %v2791_v6 = vmul.f32 -1.442695, %v4554_v19 }
 0x86e   :  { %4655 = vpow2.f32 %v2790_v3 }
 0x86f   :  { %4657 = vpow2.f32 %v2791_v6 }
 0x878   :  { %v4656_v15 = vpop.eup %4655 }
 0x879   :  { %v2721_v31 = vadd.f32 1.0, %v4656_v15  ;;  %v4658_v4 = vpop.eup %4657 }
 0x87a   :  { %v2728_v1 = vadd.f32 1.0, %v4658_v4 }
 0x87b   :  { %4659 = vrcp.f32 %v2721_v31 }
 0x87c   :  { %4661 = vrcp.f32 %v2728_v1 }
 0x885   :  { %v4660_v41 = vpop.eup %4659 }
 0x886   :  { %v2731_v26 = vmul.f32 %v4660_v41, %v2714_v59  ;;  %v4662_v32 = vpop.eup %4661 }
 0x887   :  { %v2734_v0 = vsub.f32 1.0, %v4662_v32  ;;  %v2736_v7 = vmul.f32 %v4662_v32, %v2427_v36 }
 0x888   :  { %v2732_v2 = vadd.f32 %v2731_v26, %v2573_v46 }
 0x88a   :  { %4663 = vtanh.f32 %v2732_v2 }
 0x894   :  { %v4664_v8 = vpop.eup %4663 }
 0x895   :  { %v2735_v50 = vmul.f32 %v4664_v8, %v2734_v0 }
 0x897   :  { %v2737_v28 = vadd.f32 %v2736_v7, %v2735_v50 }
 0x899   :  { %v2748_v10 = vsel %vm2745_vm0, %v2737_v28, 0.0 }
 0x89a   :  { %2750 = vst [vmem:[#allocation9 + $0x38] sm:$0xff] %v2748_v10 }
 0x89b   :  { %4742 = shalt.err (!%p4739_p0)
}
 0x89c   :  { %s4743_s18 = scalar_lea.hbm %s5637_s6, 1024 }
 0x89d   :  { %p4744_p1 = scmp.ne.s32.totalorder %s5637_s6, %s4743_s18  ;;  %p4747_p2 = scmp.lt.u32.totalorder %s4743_s18, %s5637_s6 }
 0x89f   :  { %p4749_p3 = pnand %p4747_p2, %p4744_p1 }
 0x8a1   :  { %4752 = shalt.err (!%p4749_p3)
}
 0x8a2   :  { %2762 = dma.vmem_to_hbm [thread:$0]  %s2757_s5, 1024, %s5637_s6, [#allocation5], %s4763_s2, %s4763_s2, %s4764_s21  }
 0x8a3   :  { %4757 = dma.done.wait [#allocation5], 1024  }
 0x8a4   :  { %4758 = vsyncadd [#allocation5], 4294966272 }
 0x8a5   :  { %2766 = vsyncpa [#allocation4], 1 }
 0x8a6   :  { %2767 = vsyncpa [#allocation7], 1 }
 0x8a7   :  { %2768 = vsyncpa [#allocation5], 1 }

</bundles_post_ra>
